<compile_context>
chip_gen: v7x
topology: tpu7x:2x2x1
jax: 0.10.0
libtpu: 0.0.40
codegen_flags: <defaults>
</compile_context>

<pallas_src>
import functools

import jax
import jax.numpy as jnp
from jax.experimental import pallas as pl
from jax.experimental.pallas import tpu as pltpu

LN_EPS = 1e-5
LANE = 128


def _round_up(x, m):
    return (x + m - 1) // m * m


def _tpu_flavor():
    """Returns (bf16_vector_ok, num_tensorcores_per_chip, vmem_cap_bytes)."""
    try:
        kind = jax.devices()[0].device_kind.lower()
    except Exception:
        kind = ""
    old_gen = any(t in kind for t in ("v2", "v3", "v4", "v5"))
    new_gen = ("v6" in kind) or ("v7" in kind) or ("7x" in kind)
    bf16_ok = new_gen and not old_gen
    is_v7 = ("v7" in kind) or ("7x" in kind)
    n_cores = 2 if is_v7 else 1
    vmem_cap = (56 << 20) if is_v7 else (100 << 20)
    return bf16_ok, n_cores, vmem_cap


def _fasterkan_kernel(x_ref, *refs, layer_dims, grids_scaled, compute_dtype):
    """Fused FasterKAN forward. All layers computed inside one kernel body.

    x_ref:    [tb, D_in0]         VMEM f32   (batch tile of the input)
    per layer l (in refs):
      gamma_s:  [1, D_in]         VMEM f32   (LayerNorm weight * inv_denominator)
      beta_s:   [1, D_in]         VMEM f32   (LayerNorm bias   * inv_denominator)
      w:        [G*D_in, D_out_p] VMEM bf16  (spline weight, rows g*D_in + d,
                                              output columns zero-padded)
    o_ref:    [tb, D_out_p_last]  VMEM f32
    phi_scr:  [tb, max(G*D_in)]   VMEM bf16  scratch slab
    Grid values (pre-scaled by inv_denominator) are baked in as constants.
    """
    o_ref = refs[-2]
    phi_scr = refs[-1]
    p_refs = refs[:-2]
    num_layers = len(layer_dims)

    h = x_ref[...].astype(jnp.float32)
    for l, (d_in, d_out, d_out_pad) in enumerate(layer_dims):
        gamma_s = p_refs[3 * l + 0][...]
        beta_s = p_refs[3 * l + 1][...]
        w_ref = p_refs[3 * l + 2]

        # LayerNorm over features (biased variance, eps inside sqrt), f32 stats.
        # gamma_s/beta_s already carry the inv_denominator factor.
        mean = jnp.mean(h, axis=-1, keepdims=True)
        var = jnp.mean((h - mean) ** 2, axis=-1, keepdims=True)
        a = (h - mean) * jax.lax.rsqrt(var + LN_EPS) * gamma_s + beta_s
        a = a.astype(compute_dtype)  # bf16 on v6e/v7x, f32 on v5e

        # RBF slab phi[b, g*d_in + d] = 1 - tanh(a[b, d] - grid_scaled[g])^2,
        # built one grid chunk at a time into the bf16 scratch (no f32 concat).
        grid_l = grids_scaled[l]
        for gi, gval in enumerate(grid_l):
            t = jnp.tanh(a - gval)                   # scalar constant subtract
            phi_scr[:, gi * d_in:(gi + 1) * d_in] = (1.0 - t * t).astype(phi_scr.dtype)

        gd = len(grid_l) * d_in
        phi = phi_scr[:, :gd]

        # Single MXU matmul per layer, K = G*d_in, f32 accumulation.
        acc = jnp.dot(phi, w_ref[...], preferred_element_type=jnp.float32)

        if l + 1 < num_layers:
            h = acc[:, :d_out]          # drop the zero padding columns
        else:
            h = acc

    o_ref[...] = h.astype(o_ref.dtype)


def init_fasterkan_params(key, layers_hidden, *, grid_min=-1.2, grid_max=1.2,
                          num_grids=8, inv_denominator=0.5,
                          spline_weight_init_scale=1.0):
    """Deterministic parameter init mirroring FasterKAN.__init__ (PyTorch layout)."""
    params = []
    grid = jnp.linspace(grid_min, grid_max, num_grids).astype(jnp.float32)
    for d_in, d_out in zip(layers_hidden[:-1], layers_hidden[1:]):
        key, wk = jax.random.split(key)
        # SplineLinear: trunc_normal_(weight, std=init_scale), no bias.
        w = (jax.random.truncated_normal(wk, -2.0, 2.0,
                                         (d_out, d_in * num_grids),
                                         dtype=jnp.float32)
             * spline_weight_init_scale)
        params.append(dict(
            gamma=jnp.ones((d_in,), jnp.float32),   # LayerNorm weight
            beta=jnp.zeros((d_in,), jnp.float32),   # LayerNorm bias
            grid=grid,
            inv_denominator=float(inv_denominator),
            weight=w,                               # PyTorch layout [D_out, D_in*G]
        ))
    return params


def pack_fasterkan_params(params):
    """One-time repack into kernel layout (done at init time, not per call)."""
    packed = {"layers": [], "layer_dims": [], "grids_scaled": [], "num_grids": None}
    for p in params:
        d_out, dg = p["weight"].shape
        g = int(p["grid"].shape[0])
        d_in = dg // g
        assert d_in * g == dg
        assert d_in % 8 == 0, "d_in must be a multiple of 8 (f32 sublane tiling)"
        assert (g * d_in) % 16 == 0, "G*d_in must be a multiple of 16 (bf16 tiling)"
        d_out_pad = _round_up(d_out, LANE)
        inv = float(p["inv_denominator"])

        # W.T rows are indexed by f = d*G + g; reorder to rows g*D_in + d so a
        # single lane-concatenated phi slab multiplies it directly.
        w_perm = (p["weight"].T.reshape(d_in, g, d_out)
                  .transpose(1, 0, 2).reshape(g * d_in, d_out))
        w_pad = jnp.pad(w_perm, ((0, 0), (0, d_out_pad - d_out)))

        packed["layers"].append(dict(
            gamma_s=(p["gamma"] * inv).reshape(1, d_in).astype(jnp.float32),
            beta_s=(p["beta"] * inv).reshape(1, d_in).astype(jnp.float32),
            w=w_pad.astype(jnp.bfloat16),
        ))
        packed["layer_dims"].append((d_in, d_out, d_out_pad))
        # Grid values are static (train_grid / train_inv_denominator are False in
        # the reference module), so bake (grid * inv_denominator) into the kernel.
        # TODO(synk): if train_grid / train_inv_denominator were True these would
        # have to become SMEM inputs instead of baked constants.
        packed["grids_scaled"].append(tuple(float(v) * inv for v in p["grid"]))
        packed["num_grids"] = g
    return packed


def fasterkan_forward(x, packed, *, tb=None, interpret=False):
    """Fused FasterKAN forward. x: [B, D_in0] -> [B, D_out_last]."""
    B, d_in0 = x.shape
    layer_dims = packed["layer_dims"]
    grids_scaled = tuple(packed["grids_scaled"])
    num_grids = packed["num_grids"]
    assert d_in0 == layer_dims[0][0]
    d_out_last, d_out_pad_last = layer_dims[-1][1], layer_dims[-1][2]
    max_gd = max(num_grids * d for d, _, _ in layer_dims)

    bf16_vec_ok, n_cores, vmem_cap = _tpu_flavor()
    compute_dtype = jnp.bfloat16 if bf16_vec_ok else jnp.float32

    # Batch tiling: <=256 rows per tile, >= n_cores tiles when the batch permits
    # (v7x has 2 TensorCores), padding waste bounded to < 8 rows per tile.
    if tb is None:
        n_tiles = max(pl.cdiv(B, 256), n_cores if B >= 8 * n_cores else 1)
        tb = _round_up(pl.cdiv(B, n_tiles), 8)
    tb = _round_up(tb, 8)
    b_pad = _round_up(B, tb)

    x = x.astype(jnp.float32)
    if b_pad != B:
        x = jnp.pad(x, ((0, b_pad - B), (0, 0)))

    kernel = functools.partial(
        _fasterkan_kernel,
        layer_dims=tuple(layer_dims),
        grids_scaled=grids_scaled,
        compute_dtype=compute_dtype,
    )

    inputs = [x]
    for lp in packed["layers"]:
        inputs += [lp["gamma_s"], lp["beta_s"], lp["w"]]

    def build_in_specs(use_buffered):
        # Per-layer params are grid-invariant: single-buffer them (Buffered(1)).
        inv_kw = dict(pipeline_mode=pl.Buffered(1)) if use_buffered else {}
        specs = [pl.BlockSpec((tb, d_in0), lambda i: (i, 0))]        # x, batch-tiled
        for (d_in, _, d_out_pad) in layer_dims:
            specs += [
                pl.BlockSpec((1, d_in), lambda i: (0, 0), **inv_kw),                    # gamma_s
                pl.BlockSpec((1, d_in), lambda i: (0, 0), **inv_kw),                    # beta_s
                pl.BlockSpec((num_grids * d_in, d_out_pad), lambda i: (0, 0), **inv_kw),  # weight
            ]
        return specs

    def vmem_estimate(use_buffered):
        est = 2 * tb * d_in0 * 4 + 2 * tb * d_out_pad_last * 4 + tb * max_gd * 2
        for (d_in, _, d_out_pad) in layer_dims:
            per = num_grids * d_in * d_out_pad * 2 + 2 * d_in * 4
            est += per * (1 if use_buffered else 2)
            est += 3 * tb * max(d_in, d_out_pad) * 4      # live intermediates
        return est

    flops = int(2 * b_pad * sum(num_grids * di * dp for di, _, dp in layer_dims))
    transcendentals = int(b_pad * sum(num_grids * di for di, _, _ in layer_dims))
    bytes_accessed = int(
        x.size * 4 + b_pad * d_out_pad_last * 4
        + sum(int(lp["w"].size) * 2 + int(lp["gamma_s"].size) * 8
              for lp in packed["layers"]))

    def run(use_buffered):
        vmem_limit = min(vmem_cap,
                         max(32 << 20, int(vmem_estimate(use_buffered) * 1.5)))
        return pl.pallas_call(
            kernel,
            out_shape=jax.ShapeDtypeStruct((b_pad, d_out_pad_last), jnp.float32),
            grid=(b_pad // tb,),
            in_specs=build_in_specs(use_buffered),
            out_specs=pl.BlockSpec((tb, d_out_pad_last), lambda i: (i, 0)),
            scratch_shapes=[pltpu.VMEM((tb, max_gd), jnp.bfloat16)],
            compiler_params=pltpu.CompilerParams(
                dimension_semantics=("parallel",),
                vmem_limit_bytes=vmem_limit),
            cost_estimate=pl.CostEstimate(flops=flops,
                                          transcendentals=transcendentals,
                                          bytes_accessed=bytes_accessed),
            interpret=interpret,
        )(*inputs)

    try:
        out = run(True)
    except Exception:
        # Fallback for JAX versions without BlockSpec pipeline_mode support.
        out = run(False)

    return out[:B, :d_out_last]


# ----- pure-JAX f32 reference (mirrors the PyTorch forward exactly) -----
def _ref_layer(x, p):
    mean = x.mean(-1, keepdims=True)
    var = ((x - mean) ** 2).mean(-1, keepdims=True)
    xn = (x - mean) / jnp.sqrt(var + LN_EPS) * p["gamma"] + p["beta"]
    phi = 1.0 - jnp.tanh((xn[..., None] - p["grid"]) * p["inv_denominator"]) ** 2
    phi = phi.reshape(x.shape[0], -1)
    return phi @ p["weight"].T


def _ref_forward(x, params):
    for p in params:
        x = _ref_layer(x, p)
    return x


if __name__ == "__main__":
    key = jax.random.PRNGKey(0)
    layers_hidden = [32, 64, 16]     # FasterKAN([32, 64, 16])
    B = 16

    kx, kp = jax.random.split(key)
    x = jax.random.normal(kx, (B, layers_hidden[0]), dtype=jnp.float32)
    params = init_fasterkan_params(kp, layers_hidden)
    packed = pack_fasterkan_params(params)

    out = fasterkan_forward(x, packed)
    out = jax.block_until_ready(out)

    ref = _ref_forward(x, params)
    assert out.shape == (B, layers_hidden[-1]), out.shape
    # bf16 MXU operands everywhere; on v6e/v7x the RBF chain is also bf16
    # (f32 LayerNorm stats) -> loosened tolerance vs the pure-f32 reference.
    err = float(jnp.max(jnp.abs(out - ref)))
    scale = float(jnp.max(jnp.abs(ref))) + 1e-6
    assert err <= 6e-2 * scale + 5e-2, f"max err {err} (ref scale {scale})"

    print("KERNEL_OK")
</pallas_src>

<mosaic_0001>
module attributes {stable_mosaic.version = 11 : i64} {
  func.func @_fasterkan_kernel(%arg0: i32, %arg1: memref<16x32xf32, #tpu.memory_space<vmem>>, %arg2: memref<1x32xf32, #tpu.memory_space<vmem>>, %arg3: memref<1x32xf32, #tpu.memory_space<vmem>>, %arg4: memref<256x128xbf16, #tpu.memory_space<vmem>>, %arg5: memref<1x64xf32, #tpu.memory_space<vmem>>, %arg6: memref<1x64xf32, #tpu.memory_space<vmem>>, %arg7: memref<512x128xbf16, #tpu.memory_space<vmem>>, %arg8: memref<16x128xf32, #tpu.memory_space<vmem>>, %arg9: memref<16x512xbf16, #tpu.memory_space<vmem>>) attributes {dimension_semantics = [#tpu.dimension_semantics<parallel>], iteration_bounds = array<i64: 1>, scalar_prefetch = 0 : i64, scratch_operands = 1 : i64, tpu.core_type = #tpu.core_type<tc>, window_params = [{transform_indices = @transform_0, window_bounds = array<i64: 16, 32>}, {pipeline_mode = #tpu.pipeline_mode<synchronous>, transform_indices = @transform_1, window_bounds = array<i64: 1, 32>}, {pipeline_mode = #tpu.pipeline_mode<synchronous>, transform_indices = @transform_2, window_bounds = array<i64: 1, 32>}, {pipeline_mode = #tpu.pipeline_mode<synchronous>, transform_indices = @transform_3, window_bounds = array<i64: 256, 128>}, {pipeline_mode = #tpu.pipeline_mode<synchronous>, transform_indices = @transform_4, window_bounds = array<i64: 1, 64>}, {pipeline_mode = #tpu.pipeline_mode<synchronous>, transform_indices = @transform_5, window_bounds = array<i64: 1, 64>}, {pipeline_mode = #tpu.pipeline_mode<synchronous>, transform_indices = @transform_6, window_bounds = array<i64: 512, 128>}, {transform_indices = @transform_7, window_bounds = array<i64: 16, 128>}]} {
    %c0 = arith.constant 0 : index
    %c0_0 = arith.constant 0 : index
    %0 = vector.load %arg1[%c0, %c0_0] : memref<16x32xf32, #tpu.memory_space<vmem>>, vector<16x32xf32>
    %c0_1 = arith.constant 0 : index
    %c0_2 = arith.constant 0 : index
    %1 = vector.load %arg2[%c0_1, %c0_2] : memref<1x32xf32, #tpu.memory_space<vmem>>, vector<1x32xf32>
    %c0_3 = arith.constant 0 : index
    %c0_4 = arith.constant 0 : index
    %2 = vector.load %arg3[%c0_3, %c0_4] : memref<1x32xf32, #tpu.memory_space<vmem>>, vector<1x32xf32>
    %cst = arith.constant dense<0.000000e+00> : vector<16xf32>
    %3 = vector.multi_reduction <add>, %0, %cst [1] : vector<16x32xf32> to vector<16xf32>
    %4 = vector.shape_cast %3 : vector<16xf32> to vector<16x1xf32>
    %cst_5 = arith.constant 3.200000e+01 : f32
    %5 = vector.broadcast %cst_5 : f32 to vector<16x1xf32>
    %6 = arith.divf %4, %5 : vector<16x1xf32>
    %7 = vector.broadcast %6 : vector<16x1xf32> to vector<16x32xf32>
    %8 = arith.subf %0, %7 : vector<16x32xf32>
    %9 = arith.mulf %8, %8 : vector<16x32xf32>
    %cst_6 = arith.constant dense<0.000000e+00> : vector<16xf32>
    %10 = vector.multi_reduction <add>, %9, %cst_6 [1] : vector<16x32xf32> to vector<16xf32>
    %11 = vector.shape_cast %10 : vector<16xf32> to vector<16x1xf32>
    %cst_7 = arith.constant 3.200000e+01 : f32
    %12 = vector.broadcast %cst_7 : f32 to vector<16x1xf32>
    %13 = arith.divf %11, %12 : vector<16x1xf32>
    %14 = vector.broadcast %6 : vector<16x1xf32> to vector<16x32xf32>
    %15 = arith.subf %0, %14 : vector<16x32xf32>
    %cst_8 = arith.constant 9.99999974E-6 : f32
    %16 = vector.broadcast %cst_8 : f32 to vector<16x1xf32>
    %17 = arith.addf %13, %16 : vector<16x1xf32>
    %18 = math.rsqrt %17 : vector<16x1xf32>
    %19 = vector.broadcast %18 : vector<16x1xf32> to vector<16x32xf32>
    %20 = arith.mulf %15, %19 : vector<16x32xf32>
    %21 = vector.broadcast %1 : vector<1x32xf32> to vector<16x32xf32>
    %22 = arith.mulf %20, %21 : vector<16x32xf32>
    %23 = vector.broadcast %2 : vector<1x32xf32> to vector<16x32xf32>
    %24 = arith.addf %22, %23 : vector<16x32xf32>
    %cst_9 = arith.constant -6.000000e-01 : f32
    %25 = vector.broadcast %cst_9 : f32 to vector<16x32xf32>
    %26 = arith.subf %24, %25 : vector<16x32xf32>
    %27 = math.tanh %26 : vector<16x32xf32>
    %28 = arith.mulf %27, %27 : vector<16x32xf32>
    %cst_10 = arith.constant 1.000000e+00 : f32
    %29 = vector.broadcast %cst_10 : f32 to vector<16x32xf32>
    %30 = arith.subf %29, %28 : vector<16x32xf32>
    %31 = arith.truncf %30 : vector<16x32xf32> to vector<16x32xbf16>
    %c0_11 = arith.constant 0 : index
    %c0_12 = arith.constant 0 : index
    %32 = vector.load %arg9[%c0_11, %c0_12] : memref<16x512xbf16, #tpu.memory_space<vmem>>, vector<16x32xbf16>
    tpu.vector_store %arg9[%c0_11, %c0_12], %31 {strides = array<i32>} : memref<16x512xbf16, #tpu.memory_space<vmem>>, vector<16x32xbf16>,
    %cst_13 = arith.constant -0.428571433 : f32
    %33 = vector.broadcast %cst_13 : f32 to vector<16x32xf32>
    %34 = arith.subf %24, %33 : vector<16x32xf32>
    %35 = math.tanh %34 : vector<16x32xf32>
    %36 = arith.mulf %35, %35 : vector<16x32xf32>
    %cst_14 = arith.constant 1.000000e+00 : f32
    %37 = vector.broadcast %cst_14 : f32 to vector<16x32xf32>
    %38 = arith.subf %37, %36 : vector<16x32xf32>
    %39 = arith.truncf %38 : vector<16x32xf32> to vector<16x32xbf16>
    %c0_15 = arith.constant 0 : index
    %c32 = arith.constant 32 : index
    %40 = vector.load %arg9[%c0_15, %c32] : memref<16x512xbf16, #tpu.memory_space<vmem>>, vector<16x32xbf16>
    tpu.vector_store %arg9[%c0_15, %c32], %39 {strides = array<i32>} : memref<16x512xbf16, #tpu.memory_space<vmem>>, vector<16x32xbf16>,
    %cst_16 = arith.constant -0.257142872 : f32
    %41 = vector.broadcast %cst_16 : f32 to vector<16x32xf32>
    %42 = arith.subf %24, %41 : vector<16x32xf32>
    %43 = math.tanh %42 : vector<16x32xf32>
    %44 = arith.mulf %43, %43 : vector<16x32xf32>
    %cst_17 = arith.constant 1.000000e+00 : f32
    %45 = vector.broadcast %cst_17 : f32 to vector<16x32xf32>
    %46 = arith.subf %45, %44 : vector<16x32xf32>
    %47 = arith.truncf %46 : vector<16x32xf32> to vector<16x32xbf16>
    %c0_18 = arith.constant 0 : index
    %c64 = arith.constant 64 : index
    %48 = vector.load %arg9[%c0_18, %c64] : memref<16x512xbf16, #tpu.memory_space<vmem>>, vector<16x32xbf16>
    tpu.vector_store %arg9[%c0_18, %c64], %47 {strides = array<i32>} : memref<16x512xbf16, #tpu.memory_space<vmem>>, vector<16x32xbf16>,
    %cst_19 = arith.constant -0.0857142359 : f32
    %49 = vector.broadcast %cst_19 : f32 to vector<16x32xf32>
    %50 = arith.subf %24, %49 : vector<16x32xf32>
    %51 = math.tanh %50 : vector<16x32xf32>
    %52 = arith.mulf %51, %51 : vector<16x32xf32>
    %cst_20 = arith.constant 1.000000e+00 : f32
    %53 = vector.broadcast %cst_20 : f32 to vector<16x32xf32>
    %54 = arith.subf %53, %52 : vector<16x32xf32>
    %55 = arith.truncf %54 : vector<16x32xf32> to vector<16x32xbf16>
    %c0_21 = arith.constant 0 : index
    %c96 = arith.constant 96 : index
    %56 = vector.load %arg9[%c0_21, %c96] : memref<16x512xbf16, #tpu.memory_space<vmem>>, vector<16x32xbf16>
    tpu.vector_store %arg9[%c0_21, %c96], %55 {strides = array<i32>} : memref<16x512xbf16, #tpu.memory_space<vmem>>, vector<16x32xbf16>,
    %cst_22 = arith.constant 0.0857143402 : f32
    %57 = vector.broadcast %cst_22 : f32 to vector<16x32xf32>
    %58 = arith.subf %24, %57 : vector<16x32xf32>
    %59 = math.tanh %58 : vector<16x32xf32>
    %60 = arith.mulf %59, %59 : vector<16x32xf32>
    %cst_23 = arith.constant 1.000000e+00 : f32
    %61 = vector.broadcast %cst_23 : f32 to vector<16x32xf32>
    %62 = arith.subf %61, %60 : vector<16x32xf32>
    %63 = arith.truncf %62 : vector<16x32xf32> to vector<16x32xbf16>
    %c0_24 = arith.constant 0 : index
    %c128 = arith.constant 128 : index
    %64 = vector.load %arg9[%c0_24, %c128] : memref<16x512xbf16, #tpu.memory_space<vmem>>, vector<16x32xbf16>
    tpu.vector_store %arg9[%c0_24, %c128], %63 {strides = array<i32>} : memref<16x512xbf16, #tpu.memory_space<vmem>>, vector<16x32xbf16>,
    %cst_25 = arith.constant 0.257142901 : f32
    %65 = vector.broadcast %cst_25 : f32 to vector<16x32xf32>
    %66 = arith.subf %24, %65 : vector<16x32xf32>
    %67 = math.tanh %66 : vector<16x32xf32>
    %68 = arith.mulf %67, %67 : vector<16x32xf32>
    %cst_26 = arith.constant 1.000000e+00 : f32
    %69 = vector.broadcast %cst_26 : f32 to vector<16x32xf32>
    %70 = arith.subf %69, %68 : vector<16x32xf32>
    %71 = arith.truncf %70 : vector<16x32xf32> to vector<16x32xbf16>
    %c0_27 = arith.constant 0 : index
    %c160 = arith.constant 160 : index
    %72 = vector.load %arg9[%c0_27, %c160] : memref<16x512xbf16, #tpu.memory_space<vmem>>, vector<16x32xbf16>
    tpu.vector_store %arg9[%c0_27, %c160], %71 {strides = array<i32>} : memref<16x512xbf16, #tpu.memory_space<vmem>>, vector<16x32xbf16>,
    %cst_28 = arith.constant 0.428571522 : f32
    %73 = vector.broadcast %cst_28 : f32 to vector<16x32xf32>
    %74 = arith.subf %24, %73 : vector<16x32xf32>
    %75 = math.tanh %74 : vector<16x32xf32>
    %76 = arith.mulf %75, %75 : vector<16x32xf32>
    %cst_29 = arith.constant 1.000000e+00 : f32
    %77 = vector.broadcast %cst_29 : f32 to vector<16x32xf32>
    %78 = arith.subf %77, %76 : vector<16x32xf32>
    %79 = arith.truncf %78 : vector<16x32xf32> to vector<16x32xbf16>
    %c0_30 = arith.constant 0 : index
    %c192 = arith.constant 192 : index
    %80 = vector.load %arg9[%c0_30, %c192] : memref<16x512xbf16, #tpu.memory_space<vmem>>, vector<16x32xbf16>
    tpu.vector_store %arg9[%c0_30, %c192], %79 {strides = array<i32>} : memref<16x512xbf16, #tpu.memory_space<vmem>>, vector<16x32xbf16>,
    %cst_31 = arith.constant 6.000000e-01 : f32
    %81 = vector.broadcast %cst_31 : f32 to vector<16x32xf32>
    %82 = arith.subf %24, %81 : vector<16x32xf32>
    %83 = math.tanh %82 : vector<16x32xf32>
    %84 = arith.mulf %83, %83 : vector<16x32xf32>
    %cst_32 = arith.constant 1.000000e+00 : f32
    %85 = vector.broadcast %cst_32 : f32 to vector<16x32xf32>
    %86 = arith.subf %85, %84 : vector<16x32xf32>
    %87 = arith.truncf %86 : vector<16x32xf32> to vector<16x32xbf16>
    %c0_33 = arith.constant 0 : index
    %c224 = arith.constant 224 : index
    %88 = vector.load %arg9[%c0_33, %c224] : memref<16x512xbf16, #tpu.memory_space<vmem>>, vector<16x32xbf16>
    tpu.vector_store %arg9[%c0_33, %c224], %87 {strides = array<i32>} : memref<16x512xbf16, #tpu.memory_space<vmem>>, vector<16x32xbf16>,
    %c0_34 = arith.constant 0 : index
    %c0_35 = arith.constant 0 : index
    %89 = vector.load %arg9[%c0_34, %c0_35] : memref<16x512xbf16, #tpu.memory_space<vmem>>, vector<16x256xbf16>
    %c0_36 = arith.constant 0 : index
    %c0_37 = arith.constant 0 : index
    %90 = vector.load %arg4[%c0_36, %c0_37] : memref<256x128xbf16, #tpu.memory_space<vmem>>, vector<256x128xbf16>
    %cst_38 = arith.constant dense<0.000000e+00> : vector<16x128xf32>
    %91 = tpu.matmul %89, %90, %cst_38 {dimension_numbers = #tpu.dot_dimension_numbers<[1], [0], [0], [1], [0, 0, 1, 1], [], []>} : vector<16x256xbf16>, vector<256x128xbf16>, vector<16x128xf32> -> vector<16x128xf32>
    %92 = vector.extract_strided_slice %91 {offsets = [0, 0], sizes = [16, 64], strides = [1, 1]} : vector<16x128xf32> to vector<16x64xf32>
    %c0_39 = arith.constant 0 : index
    %c0_40 = arith.constant 0 : index
    %93 = vector.load %arg5[%c0_39, %c0_40] : memref<1x64xf32, #tpu.memory_space<vmem>>, vector<1x64xf32>
    %c0_41 = arith.constant 0 : index
    %c0_42 = arith.constant 0 : index
    %94 = vector.load %arg6[%c0_41, %c0_42] : memref<1x64xf32, #tpu.memory_space<vmem>>, vector<1x64xf32>
    %cst_43 = arith.constant dense<0.000000e+00> : vector<16xf32>
    %95 = vector.multi_reduction <add>, %92, %cst_43 [1] : vector<16x64xf32> to vector<16xf32>
    %96 = vector.shape_cast %95 : vector<16xf32> to vector<16x1xf32>
    %cst_44 = arith.constant 6.400000e+01 : f32
    %97 = vector.broadcast %cst_44 : f32 to vector<16x1xf32>
    %98 = arith.divf %96, %97 : vector<16x1xf32>
    %99 = vector.broadcast %98 : vector<16x1xf32> to vector<16x64xf32>
    %100 = arith.subf %92, %99 : vector<16x64xf32>
    %101 = arith.mulf %100, %100 : vector<16x64xf32>
    %cst_45 = arith.constant dense<0.000000e+00> : vector<16xf32>
    %102 = vector.multi_reduction <add>, %101, %cst_45 [1] : vector<16x64xf32> to vector<16xf32>
    %103 = vector.shape_cast %102 : vector<16xf32> to vector<16x1xf32>
    %cst_46 = arith.constant 6.400000e+01 : f32
    %104 = vector.broadcast %cst_46 : f32 to vector<16x1xf32>
    %105 = arith.divf %103, %104 : vector<16x1xf32>
    %106 = vector.broadcast %98 : vector<16x1xf32> to vector<16x64xf32>
    %107 = arith.subf %92, %106 : vector<16x64xf32>
    %cst_47 = arith.constant 9.99999974E-6 : f32
    %108 = vector.broadcast %cst_47 : f32 to vector<16x1xf32>
    %109 = arith.addf %105, %108 : vector<16x1xf32>
    %110 = math.rsqrt %109 : vector<16x1xf32>
    %111 = vector.broadcast %110 : vector<16x1xf32> to vector<16x64xf32>
    %112 = arith.mulf %107, %111 : vector<16x64xf32>
    %113 = vector.broadcast %93 : vector<1x64xf32> to vector<16x64xf32>
    %114 = arith.mulf %112, %113 : vector<16x64xf32>
    %115 = vector.broadcast %94 : vector<1x64xf32> to vector<16x64xf32>
    %116 = arith.addf %114, %115 : vector<16x64xf32>
    %cst_48 = arith.constant -6.000000e-01 : f32
    %117 = vector.broadcast %cst_48 : f32 to vector<16x64xf32>
    %118 = arith.subf %116, %117 : vector<16x64xf32>
    %119 = math.tanh %118 : vector<16x64xf32>
    %120 = arith.mulf %119, %119 : vector<16x64xf32>
    %cst_49 = arith.constant 1.000000e+00 : f32
    %121 = vector.broadcast %cst_49 : f32 to vector<16x64xf32>
    %122 = arith.subf %121, %120 : vector<16x64xf32>
    %123 = arith.truncf %122 : vector<16x64xf32> to vector<16x64xbf16>
    %c0_50 = arith.constant 0 : index
    %c0_51 = arith.constant 0 : index
    %124 = vector.load %arg9[%c0_50, %c0_51] : memref<16x512xbf16, #tpu.memory_space<vmem>>, vector<16x64xbf16>
    tpu.vector_store %arg9[%c0_50, %c0_51], %123 {strides = array<i32>} : memref<16x512xbf16, #tpu.memory_space<vmem>>, vector<16x64xbf16>,
    %cst_52 = arith.constant -0.428571433 : f32
    %125 = vector.broadcast %cst_52 : f32 to vector<16x64xf32>
    %126 = arith.subf %116, %125 : vector<16x64xf32>
    %127 = math.tanh %126 : vector<16x64xf32>
    %128 = arith.mulf %127, %127 : vector<16x64xf32>
    %cst_53 = arith.constant 1.000000e+00 : f32
    %129 = vector.broadcast %cst_53 : f32 to vector<16x64xf32>
    %130 = arith.subf %129, %128 : vector<16x64xf32>
    %131 = arith.truncf %130 : vector<16x64xf32> to vector<16x64xbf16>
    %c0_54 = arith.constant 0 : index
    %c64_55 = arith.constant 64 : index
    %132 = vector.load %arg9[%c0_54, %c64_55] : memref<16x512xbf16, #tpu.memory_space<vmem>>, vector<16x64xbf16>
    tpu.vector_store %arg9[%c0_54, %c64_55], %131 {strides = array<i32>} : memref<16x512xbf16, #tpu.memory_space<vmem>>, vector<16x64xbf16>,
    %cst_56 = arith.constant -0.257142872 : f32
    %133 = vector.broadcast %cst_56 : f32 to vector<16x64xf32>
    %134 = arith.subf %116, %133 : vector<16x64xf32>
    %135 = math.tanh %134 : vector<16x64xf32>
    %136 = arith.mulf %135, %135 : vector<16x64xf32>
    %cst_57 = arith.constant 1.000000e+00 : f32
    %137 = vector.broadcast %cst_57 : f32 to vector<16x64xf32>
    %138 = arith.subf %137, %136 : vector<16x64xf32>
    %139 = arith.truncf %138 : vector<16x64xf32> to vector<16x64xbf16>
    %c0_58 = arith.constant 0 : index
    %c128_59 = arith.constant 128 : index
    %140 = vector.load %arg9[%c0_58, %c128_59] : memref<16x512xbf16, #tpu.memory_space<vmem>>, vector<16x64xbf16>
    tpu.vector_store %arg9[%c0_58, %c128_59], %139 {strides = array<i32>} : memref<16x512xbf16, #tpu.memory_space<vmem>>, vector<16x64xbf16>,
    %cst_60 = arith.constant -0.0857142359 : f32
    %141 = vector.broadcast %cst_60 : f32 to vector<16x64xf32>
    %142 = arith.subf %116, %141 : vector<16x64xf32>
    %143 = math.tanh %142 : vector<16x64xf32>
    %144 = arith.mulf %143, %143 : vector<16x64xf32>
    %cst_61 = arith.constant 1.000000e+00 : f32
    %145 = vector.broadcast %cst_61 : f32 to vector<16x64xf32>
    %146 = arith.subf %145, %144 : vector<16x64xf32>
    %147 = arith.truncf %146 : vector<16x64xf32> to vector<16x64xbf16>
    %c0_62 = arith.constant 0 : index
    %c192_63 = arith.constant 192 : index
    %148 = vector.load %arg9[%c0_62, %c192_63] : memref<16x512xbf16, #tpu.memory_space<vmem>>, vector<16x64xbf16>
    tpu.vector_store %arg9[%c0_62, %c192_63], %147 {strides = array<i32>} : memref<16x512xbf16, #tpu.memory_space<vmem>>, vector<16x64xbf16>,
    %cst_64 = arith.constant 0.0857143402 : f32
    %149 = vector.broadcast %cst_64 : f32 to vector<16x64xf32>
    %150 = arith.subf %116, %149 : vector<16x64xf32>
    %151 = math.tanh %150 : vector<16x64xf32>
    %152 = arith.mulf %151, %151 : vector<16x64xf32>
    %cst_65 = arith.constant 1.000000e+00 : f32
    %153 = vector.broadcast %cst_65 : f32 to vector<16x64xf32>
    %154 = arith.subf %153, %152 : vector<16x64xf32>
    %155 = arith.truncf %154 : vector<16x64xf32> to vector<16x64xbf16>
    %c0_66 = arith.constant 0 : index
    %c256 = arith.constant 256 : index
    %156 = vector.load %arg9[%c0_66, %c256] : memref<16x512xbf16, #tpu.memory_space<vmem>>, vector<16x64xbf16>
    tpu.vector_store %arg9[%c0_66, %c256], %155 {strides = array<i32>} : memref<16x512xbf16, #tpu.memory_space<vmem>>, vector<16x64xbf16>,
    %cst_67 = arith.constant 0.257142901 : f32
    %157 = vector.broadcast %cst_67 : f32 to vector<16x64xf32>
    %158 = arith.subf %116, %157 : vector<16x64xf32>
    %159 = math.tanh %158 : vector<16x64xf32>
    %160 = arith.mulf %159, %159 : vector<16x64xf32>
    %cst_68 = arith.constant 1.000000e+00 : f32
    %161 = vector.broadcast %cst_68 : f32 to vector<16x64xf32>
    %162 = arith.subf %161, %160 : vector<16x64xf32>
    %163 = arith.truncf %162 : vector<16x64xf32> to vector<16x64xbf16>
    %c0_69 = arith.constant 0 : index
    %c320 = arith.constant 320 : index
    %164 = vector.load %arg9[%c0_69, %c320] : memref<16x512xbf16, #tpu.memory_space<vmem>>, vector<16x64xbf16>
    tpu.vector_store %arg9[%c0_69, %c320], %163 {strides = array<i32>} : memref<16x512xbf16, #tpu.memory_space<vmem>>, vector<16x64xbf16>,
    %cst_70 = arith.constant 0.428571522 : f32
    %165 = vector.broadcast %cst_70 : f32 to vector<16x64xf32>
    %166 = arith.subf %116, %165 : vector<16x64xf32>
    %167 = math.tanh %166 : vector<16x64xf32>
    %168 = arith.mulf %167, %167 : vector<16x64xf32>
    %cst_71 = arith.constant 1.000000e+00 : f32
    %169 = vector.broadcast %cst_71 : f32 to vector<16x64xf32>
    %170 = arith.subf %169, %168 : vector<16x64xf32>
    %171 = arith.truncf %170 : vector<16x64xf32> to vector<16x64xbf16>
    %c0_72 = arith.constant 0 : index
    %c384 = arith.constant 384 : index
    %172 = vector.load %arg9[%c0_72, %c384] : memref<16x512xbf16, #tpu.memory_space<vmem>>, vector<16x64xbf16>
    tpu.vector_store %arg9[%c0_72, %c384], %171 {strides = array<i32>} : memref<16x512xbf16, #tpu.memory_space<vmem>>, vector<16x64xbf16>,
    %cst_73 = arith.constant 6.000000e-01 : f32
    %173 = vector.broadcast %cst_73 : f32 to vector<16x64xf32>
    %174 = arith.subf %116, %173 : vector<16x64xf32>
    %175 = math.tanh %174 : vector<16x64xf32>
    %176 = arith.mulf %175, %175 : vector<16x64xf32>
    %cst_74 = arith.constant 1.000000e+00 : f32
    %177 = vector.broadcast %cst_74 : f32 to vector<16x64xf32>
    %178 = arith.subf %177, %176 : vector<16x64xf32>
    %179 = arith.truncf %178 : vector<16x64xf32> to vector<16x64xbf16>
    %c0_75 = arith.constant 0 : index
    %c448 = arith.constant 448 : index
    %180 = vector.load %arg9[%c0_75, %c448] : memref<16x512xbf16, #tpu.memory_space<vmem>>, vector<16x64xbf16>
    tpu.vector_store %arg9[%c0_75, %c448], %179 {strides = array<i32>} : memref<16x512xbf16, #tpu.memory_space<vmem>>, vector<16x64xbf16>,
    %c0_76 = arith.constant 0 : index
    %c0_77 = arith.constant 0 : index
    %181 = vector.load %arg9[%c0_76, %c0_77] : memref<16x512xbf16, #tpu.memory_space<vmem>>, vector<16x512xbf16>
    %c0_78 = arith.constant 0 : index
    %c0_79 = arith.constant 0 : index
    %182 = vector.load %arg7[%c0_78, %c0_79] : memref<512x128xbf16, #tpu.memory_space<vmem>>, vector<512x128xbf16>
    %cst_80 = arith.constant dense<0.000000e+00> : vector<16x128xf32>
    %183 = tpu.matmul %181, %182, %cst_80 {dimension_numbers = #tpu.dot_dimension_numbers<[1], [0], [0], [1], [0, 0, 1, 1], [], []>} : vector<16x512xbf16>, vector<512x128xbf16>, vector<16x128xf32> -> vector<16x128xf32>
    %c0_81 = arith.constant 0 : index
    %c0_82 = arith.constant 0 : index
    %184 = vector.load %arg8[%c0_81, %c0_82] : memref<16x128xf32, #tpu.memory_space<vmem>>, vector<16x128xf32>
    tpu.vector_store %arg8[%c0_81, %c0_82], %183 {strides = array<i32>} : memref<16x128xf32, #tpu.memory_space<vmem>>, vector<16x128xf32>,
    return
  }
  func.func @transform_0(%arg0: i32) -> (i32, i32) {
    %c0_i32 = arith.constant 0 : i32
    %c0_i32_0 = arith.constant 0 : i32
    return %arg0, %c0_i32 : i32, i32
  }
  func.func @transform_1(%arg0: i32) -> (i32, i32) {
    %c0_i32 = arith.constant 0 : i32
    %c0_i32_0 = arith.constant 0 : i32
    %c0_i32_1 = arith.constant 0 : i32
    return %c0_i32, %c0_i32_0 : i32, i32
  }
  func.func @transform_2(%arg0: i32) -> (i32, i32) {
    %c0_i32 = arith.constant 0 : i32
    %c0_i32_0 = arith.constant 0 : i32
    %c0_i32_1 = arith.constant 0 : i32
    return %c0_i32, %c0_i32_0 : i32, i32
  }
  func.func @transform_3(%arg0: i32) -> (i32, i32) {
    %c0_i32 = arith.constant 0 : i32
    %c0_i32_0 = arith.constant 0 : i32
    %c0_i32_1 = arith.constant 0 : i32
    return %c0_i32, %c0_i32_0 : i32, i32
  }
  func.func @transform_4(%arg0: i32) -> (i32, i32) {
    %c0_i32 = arith.constant 0 : i32
    %c0_i32_0 = arith.constant 0 : i32
    %c0_i32_1 = arith.constant 0 : i32
    return %c0_i32, %c0_i32_0 : i32, i32
  }
  func.func @transform_5(%arg0: i32) -> (i32, i32) {
    %c0_i32 = arith.constant 0 : i32
    %c0_i32_0 = arith.constant 0 : i32
    %c0_i32_1 = arith.constant 0 : i32
    return %c0_i32, %c0_i32_0 : i32, i32
  }
  func.func @transform_6(%arg0: i32) -> (i32, i32) {
    %c0_i32 = arith.constant 0 : i32
    %c0_i32_0 = arith.constant 0 : i32
    %c0_i32_1 = arith.constant 0 : i32
    return %c0_i32, %c0_i32_0 : i32, i32
  }
  func.func @transform_7(%arg0: i32) -> (i32, i32) {
    %c0_i32 = arith.constant 0 : i32
    %c0_i32_0 = arith.constant 0 : i32
    return %arg0, %c0_i32 : i32, i32
  }
}

module attributes {stable_mosaic.version = 11 : i64} {
  func.func @_fasterkan_kernel(%arg0: i32, %arg1: memref<16x32xf32, #tpu.memory_space<vmem>>, %arg2: memref<1x32xf32, #tpu.memory_space<vmem>>, %arg3: memref<1x32xf32, #tpu.memory_space<vmem>>, %arg4: memref<256x128xbf16, #tpu.memory_space<vmem>>, %arg5: memref<1x64xf32, #tpu.memory_space<vmem>>, %arg6: memref<1x64xf32, #tpu.memory_space<vmem>>, %arg7: memref<512x128xbf16, #tpu.memory_space<vmem>>, %arg8: memref<16x128xf32, #tpu.memory_space<vmem>>, %arg9: memref<16x512xbf16, #tpu.memory_space<vmem>>) attributes {dimension_semantics = [#tpu.dimension_semantics<parallel>], iteration_bounds = array<i64: 1>, scalar_prefetch = 0 : i64, scratch_operands = 1 : i64, tpu.core_type = #tpu.core_type<tc>, window_params = [{transform_indices = @transform_0, window_bounds = array<i64: 16, 32>}, {pipeline_mode = #tpu.pipeline_mode<synchronous>, transform_indices = @transform_1, window_bounds = array<i64: 1, 32>}, {pipeline_mode = #tpu.pipeline_mode<synchronous>, transform_indices = @transform_2, window_bounds = array<i64: 1, 32>}, {pipeline_mode = #tpu.pipeline_mode<synchronous>, transform_indices = @transform_3, window_bounds = array<i64: 256, 128>}, {pipeline_mode = #tpu.pipeline_mode<synchronous>, transform_indices = @transform_4, window_bounds = array<i64: 1, 64>}, {pipeline_mode = #tpu.pipeline_mode<synchronous>, transform_indices = @transform_5, window_bounds = array<i64: 1, 64>}, {pipeline_mode = #tpu.pipeline_mode<synchronous>, transform_indices = @transform_6, window_bounds = array<i64: 512, 128>}, {transform_indices = @transform_7, window_bounds = array<i64: 16, 128>}]} {
    %c0 = arith.constant 0 : index
    %c0_0 = arith.constant 0 : index
    %0 = vector.load %arg1[%c0, %c0_0] : memref<16x32xf32, #tpu.memory_space<vmem>>, vector<16x32xf32>
    %c0_1 = arith.constant 0 : index
    %c0_2 = arith.constant 0 : index
    %1 = vector.load %arg2[%c0_1, %c0_2] : memref<1x32xf32, #tpu.memory_space<vmem>>, vector<1x32xf32>
    %c0_3 = arith.constant 0 : index
    %c0_4 = arith.constant 0 : index
    %2 = vector.load %arg3[%c0_3, %c0_4] : memref<1x32xf32, #tpu.memory_space<vmem>>, vector<1x32xf32>
    %cst = arith.constant dense<0.000000e+00> : vector<16xf32>
    %3 = vector.multi_reduction <add>, %0, %cst [1] : vector<16x32xf32> to vector<16xf32>
    %4 = vector.shape_cast %3 : vector<16xf32> to vector<16x1xf32>
    %cst_5 = arith.constant 3.200000e+01 : f32
    %5 = vector.broadcast %cst_5 : f32 to vector<16x1xf32>
    %6 = arith.divf %4, %5 : vector<16x1xf32>
    %7 = vector.broadcast %6 : vector<16x1xf32> to vector<16x32xf32>
    %8 = arith.subf %0, %7 : vector<16x32xf32>
    %9 = arith.mulf %8, %8 : vector<16x32xf32>
    %cst_6 = arith.constant dense<0.000000e+00> : vector<16xf32>
    %10 = vector.multi_reduction <add>, %9, %cst_6 [1] : vector<16x32xf32> to vector<16xf32>
    %11 = vector.shape_cast %10 : vector<16xf32> to vector<16x1xf32>
    %cst_7 = arith.constant 3.200000e+01 : f32
    %12 = vector.broadcast %cst_7 : f32 to vector<16x1xf32>
    %13 = arith.divf %11, %12 : vector<16x1xf32>
    %14 = vector.broadcast %6 : vector<16x1xf32> to vector<16x32xf32>
    %15 = arith.subf %0, %14 : vector<16x32xf32>
    %cst_8 = arith.constant 9.99999974E-6 : f32
    %16 = vector.broadcast %cst_8 : f32 to vector<16x1xf32>
    %17 = arith.addf %13, %16 : vector<16x1xf32>
    %18 = math.rsqrt %17 : vector<16x1xf32>
    %19 = vector.broadcast %18 : vector<16x1xf32> to vector<16x32xf32>
    %20 = arith.mulf %15, %19 : vector<16x32xf32>
    %21 = vector.broadcast %1 : vector<1x32xf32> to vector<16x32xf32>
    %22 = arith.mulf %20, %21 : vector<16x32xf32>
    %23 = vector.broadcast %2 : vector<1x32xf32> to vector<16x32xf32>
    %24 = arith.addf %22, %23 : vector<16x32xf32>
    %cst_9 = arith.constant -6.000000e-01 : f32
    %25 = vector.broadcast %cst_9 : f32 to vector<16x32xf32>
    %26 = arith.subf %24, %25 : vector<16x32xf32>
    %27 = math.tanh %26 : vector<16x32xf32>
    %28 = arith.mulf %27, %27 : vector<16x32xf32>
    %cst_10 = arith.constant 1.000000e+00 : f32
    %29 = vector.broadcast %cst_10 : f32 to vector<16x32xf32>
    %30 = arith.subf %29, %28 : vector<16x32xf32>
    %31 = arith.truncf %30 : vector<16x32xf32> to vector<16x32xbf16>
    %c0_11 = arith.constant 0 : index
    %c0_12 = arith.constant 0 : index
    %32 = vector.load %arg9[%c0_11, %c0_12] : memref<16x512xbf16, #tpu.memory_space<vmem>>, vector<16x32xbf16>
    tpu.vector_store %arg9[%c0_11, %c0_12], %31 {strides = array<i32>} : memref<16x512xbf16, #tpu.memory_space<vmem>>, vector<16x32xbf16>,
    %cst_13 = arith.constant -0.428571433 : f32
    %33 = vector.broadcast %cst_13 : f32 to vector<16x32xf32>
    %34 = arith.subf %24, %33 : vector<16x32xf32>
    %35 = math.tanh %34 : vector<16x32xf32>
    %36 = arith.mulf %35, %35 : vector<16x32xf32>
    %cst_14 = arith.constant 1.000000e+00 : f32
    %37 = vector.broadcast %cst_14 : f32 to vector<16x32xf32>
    %38 = arith.subf %37, %36 : vector<16x32xf32>
    %39 = arith.truncf %38 : vector<16x32xf32> to vector<16x32xbf16>
    %c0_15 = arith.constant 0 : index
    %c32 = arith.constant 32 : index
    %40 = vector.load %arg9[%c0_15, %c32] : memref<16x512xbf16, #tpu.memory_space<vmem>>, vector<16x32xbf16>
    tpu.vector_store %arg9[%c0_15, %c32], %39 {strides = array<i32>} : memref<16x512xbf16, #tpu.memory_space<vmem>>, vector<16x32xbf16>,
    %cst_16 = arith.constant -0.257142872 : f32
    %41 = vector.broadcast %cst_16 : f32 to vector<16x32xf32>
    %42 = arith.subf %24, %41 : vector<16x32xf32>
    %43 = math.tanh %42 : vector<16x32xf32>
    %44 = arith.mulf %43, %43 : vector<16x32xf32>
    %cst_17 = arith.constant 1.000000e+00 : f32
    %45 = vector.broadcast %cst_17 : f32 to vector<16x32xf32>
    %46 = arith.subf %45, %44 : vector<16x32xf32>
    %47 = arith.truncf %46 : vector<16x32xf32> to vector<16x32xbf16>
    %c0_18 = arith.constant 0 : index
    %c64 = arith.constant 64 : index
    %48 = vector.load %arg9[%c0_18, %c64] : memref<16x512xbf16, #tpu.memory_space<vmem>>, vector<16x32xbf16>
    tpu.vector_store %arg9[%c0_18, %c64], %47 {strides = array<i32>} : memref<16x512xbf16, #tpu.memory_space<vmem>>, vector<16x32xbf16>,
    %cst_19 = arith.constant -0.0857142359 : f32
    %49 = vector.broadcast %cst_19 : f32 to vector<16x32xf32>
    %50 = arith.subf %24, %49 : vector<16x32xf32>
    %51 = math.tanh %50 : vector<16x32xf32>
    %52 = arith.mulf %51, %51 : vector<16x32xf32>
    %cst_20 = arith.constant 1.000000e+00 : f32
    %53 = vector.broadcast %cst_20 : f32 to vector<16x32xf32>
    %54 = arith.subf %53, %52 : vector<16x32xf32>
    %55 = arith.truncf %54 : vector<16x32xf32> to vector<16x32xbf16>
    %c0_21 = arith.constant 0 : index
    %c96 = arith.constant 96 : index
    %56 = vector.load %arg9[%c0_21, %c96] : memref<16x512xbf16, #tpu.memory_space<vmem>>, vector<16x32xbf16>
    tpu.vector_store %arg9[%c0_21, %c96], %55 {strides = array<i32>} : memref<16x512xbf16, #tpu.memory_space<vmem>>, vector<16x32xbf16>,
    %cst_22 = arith.constant 0.0857143402 : f32
    %57 = vector.broadcast %cst_22 : f32 to vector<16x32xf32>
    %58 = arith.subf %24, %57 : vector<16x32xf32>
    %59 = math.tanh %58 : vector<16x32xf32>
    %60 = arith.mulf %59, %59 : vector<16x32xf32>
    %cst_23 = arith.constant 1.000000e+00 : f32
    %61 = vector.broadcast %cst_23 : f32 to vector<16x32xf32>
    %62 = arith.subf %61, %60 : vector<16x32xf32>
    %63 = arith.truncf %62 : vector<16x32xf32> to vector<16x32xbf16>
    %c0_24 = arith.constant 0 : index
    %c128 = arith.constant 128 : index
    %64 = vector.load %arg9[%c0_24, %c128] : memref<16x512xbf16, #tpu.memory_space<vmem>>, vector<16x32xbf16>
    tpu.vector_store %arg9[%c0_24, %c128], %63 {strides = array<i32>} : memref<16x512xbf16, #tpu.memory_space<vmem>>, vector<16x32xbf16>,
    %cst_25 = arith.constant 0.257142901 : f32
    %65 = vector.broadcast %cst_25 : f32 to vector<16x32xf32>
    %66 = arith.subf %24, %65 : vector<16x32xf32>
    %67 = math.tanh %66 : vector<16x32xf32>
    %68 = arith.mulf %67, %67 : vector<16x32xf32>
    %cst_26 = arith.constant 1.000000e+00 : f32
    %69 = vector.broadcast %cst_26 : f32 to vector<16x32xf32>
    %70 = arith.subf %69, %68 : vector<16x32xf32>
    %71 = arith.truncf %70 : vector<16x32xf32> to vector<16x32xbf16>
    %c0_27 = arith.constant 0 : index
    %c160 = arith.constant 160 : index
    %72 = vector.load %arg9[%c0_27, %c160] : memref<16x512xbf16, #tpu.memory_space<vmem>>, vector<16x32xbf16>
    tpu.vector_store %arg9[%c0_27, %c160], %71 {strides = array<i32>} : memref<16x512xbf16, #tpu.memory_space<vmem>>, vector<16x32xbf16>,
    %cst_28 = arith.constant 0.428571522 : f32
    %73 = vector.broadcast %cst_28 : f32 to vector<16x32xf32>
    %74 = arith.subf %24, %73 : vector<16x32xf32>
    %75 = math.tanh %74 : vector<16x32xf32>
    %76 = arith.mulf %75, %75 : vector<16x32xf32>
    %cst_29 = arith.constant 1.000000e+00 : f32
    %77 = vector.broadcast %cst_29 : f32 to vector<16x32xf32>
    %78 = arith.subf %77, %76 : vector<16x32xf32>
    %79 = arith.truncf %78 : vector<16x32xf32> to vector<16x32xbf16>
    %c0_30 = arith.constant 0 : index
    %c192 = arith.constant 192 : index
    %80 = vector.load %arg9[%c0_30, %c192] : memref<16x512xbf16, #tpu.memory_space<vmem>>, vector<16x32xbf16>
    tpu.vector_store %arg9[%c0_30, %c192], %79 {strides = array<i32>} : memref<16x512xbf16, #tpu.memory_space<vmem>>, vector<16x32xbf16>,
    %cst_31 = arith.constant 6.000000e-01 : f32
    %81 = vector.broadcast %cst_31 : f32 to vector<16x32xf32>
    %82 = arith.subf %24, %81 : vector<16x32xf32>
    %83 = math.tanh %82 : vector<16x32xf32>
    %84 = arith.mulf %83, %83 : vector<16x32xf32>
    %cst_32 = arith.constant 1.000000e+00 : f32
    %85 = vector.broadcast %cst_32 : f32 to vector<16x32xf32>
    %86 = arith.subf %85, %84 : vector<16x32xf32>
    %87 = arith.truncf %86 : vector<16x32xf32> to vector<16x32xbf16>
    %c0_33 = arith.constant 0 : index
    %c224 = arith.constant 224 : index
    %88 = vector.load %arg9[%c0_33, %c224] : memref<16x512xbf16, #tpu.memory_space<vmem>>, vector<16x32xbf16>
    tpu.vector_store %arg9[%c0_33, %c224], %87 {strides = array<i32>} : memref<16x512xbf16, #tpu.memory_space<vmem>>, vector<16x32xbf16>,
    %c0_34 = arith.constant 0 : index
    %c0_35 = arith.constant 0 : index
    %89 = vector.load %arg9[%c0_34, %c0_35] : memref<16x512xbf16, #tpu.memory_space<vmem>>, vector<16x256xbf16>
    %c0_36 = arith.constant 0 : index
    %c0_37 = arith.constant 0 : index
    %90 = vector.load %arg4[%c0_36, %c0_37] : memref<256x128xbf16, #tpu.memory_space<vmem>>, vector<256x128xbf16>
    %cst_38 = arith.constant dense<0.000000e+00> : vector<16x128xf32>
    %91 = tpu.matmul %89, %90, %cst_38 {dimension_numbers = #tpu.dot_dimension_numbers<[1], [0], [0], [1], [0, 0, 1, 1], [], []>} : vector<16x256xbf16>, vector<256x128xbf16>, vector<16x128xf32> -> vector<16x128xf32>
    %92 = vector.extract_strided_slice %91 {offsets = [0, 0], sizes = [16, 64], strides = [1, 1]} : vector<16x128xf32> to vector<16x64xf32>
    %c0_39 = arith.constant 0 : index
    %c0_40 = arith.constant 0 : index
    %93 = vector.load %arg5[%c0_39, %c0_40] : memref<1x64xf32, #tpu.memory_space<vmem>>, vector<1x64xf32>
    %c0_41 = arith.constant 0 : index
    %c0_42 = arith.constant 0 : index
    %94 = vector.load %arg6[%c0_41, %c0_42] : memref<1x64xf32, #tpu.memory_space<vmem>>, vector<1x64xf32>
    %cst_43 = arith.constant dense<0.000000e+00> : vector<16xf32>
    %95 = vector.multi_reduction <add>, %92, %cst_43 [1] : vector<16x64xf32> to vector<16xf32>
    %96 = vector.shape_cast %95 : vector<16xf32> to vector<16x1xf32>
    %cst_44 = arith.constant 6.400000e+01 : f32
    %97 = vector.broadcast %cst_44 : f32 to vector<16x1xf32>
    %98 = arith.divf %96, %97 : vector<16x1xf32>
    %99 = vector.broadcast %98 : vector<16x1xf32> to vector<16x64xf32>
    %100 = arith.subf %92, %99 : vector<16x64xf32>
    %101 = arith.mulf %100, %100 : vector<16x64xf32>
    %cst_45 = arith.constant dense<0.000000e+00> : vector<16xf32>
    %102 = vector.multi_reduction <add>, %101, %cst_45 [1] : vector<16x64xf32> to vector<16xf32>
    %103 = vector.shape_cast %102 : vector<16xf32> to vector<16x1xf32>
    %cst_46 = arith.constant 6.400000e+01 : f32
    %104 = vector.broadcast %cst_46 : f32 to vector<16x1xf32>
    %105 = arith.divf %103, %104 : vector<16x1xf32>
    %106 = vector.broadcast %98 : vector<16x1xf32> to vector<16x64xf32>
    %107 = arith.subf %92, %106 : vector<16x64xf32>
    %cst_47 = arith.constant 9.99999974E-6 : f32
    %108 = vector.broadcast %cst_47 : f32 to vector<16x1xf32>
    %109 = arith.addf %105, %108 : vector<16x1xf32>
    %110 = math.rsqrt %109 : vector<16x1xf32>
    %111 = vector.broadcast %110 : vector<16x1xf32> to vector<16x64xf32>
    %112 = arith.mulf %107, %111 : vector<16x64xf32>
    %113 = vector.broadcast %93 : vector<1x64xf32> to vector<16x64xf32>
    %114 = arith.mulf %112, %113 : vector<16x64xf32>
    %115 = vector.broadcast %94 : vector<1x64xf32> to vector<16x64xf32>
    %116 = arith.addf %114, %115 : vector<16x64xf32>
    %cst_48 = arith.constant -6.000000e-01 : f32
    %117 = vector.broadcast %cst_48 : f32 to vector<16x64xf32>
    %118 = arith.subf %116, %117 : vector<16x64xf32>
    %119 = math.tanh %118 : vector<16x64xf32>
    %120 = arith.mulf %119, %119 : vector<16x64xf32>
    %cst_49 = arith.constant 1.000000e+00 : f32
    %121 = vector.broadcast %cst_49 : f32 to vector<16x64xf32>
    %122 = arith.subf %121, %120 : vector<16x64xf32>
    %123 = arith.truncf %122 : vector<16x64xf32> to vector<16x64xbf16>
    %c0_50 = arith.constant 0 : index
    %c0_51 = arith.constant 0 : index
    %124 = vector.load %arg9[%c0_50, %c0_51] : memref<16x512xbf16, #tpu.memory_space<vmem>>, vector<16x64xbf16>
    tpu.vector_store %arg9[%c0_50, %c0_51], %123 {strides = array<i32>} : memref<16x512xbf16, #tpu.memory_space<vmem>>, vector<16x64xbf16>,
    %cst_52 = arith.constant -0.428571433 : f32
    %125 = vector.broadcast %cst_52 : f32 to vector<16x64xf32>
    %126 = arith.subf %116, %125 : vector<16x64xf32>
    %127 = math.tanh %126 : vector<16x64xf32>
    %128 = arith.mulf %127, %127 : vector<16x64xf32>
    %cst_53 = arith.constant 1.000000e+00 : f32
    %129 = vector.broadcast %cst_53 : f32 to vector<16x64xf32>
    %130 = arith.subf %129, %128 : vector<16x64xf32>
    %131 = arith.truncf %130 : vector<16x64xf32> to vector<16x64xbf16>
    %c0_54 = arith.constant 0 : index
    %c64_55 = arith.constant 64 : index
    %132 = vector.load %arg9[%c0_54, %c64_55] : memref<16x512xbf16, #tpu.memory_space<vmem>>, vector<16x64xbf16>
    tpu.vector_store %arg9[%c0_54, %c64_55], %131 {strides = array<i32>} : memref<16x512xbf16, #tpu.memory_space<vmem>>, vector<16x64xbf16>,
    %cst_56 = arith.constant -0.257142872 : f32
    %133 = vector.broadcast %cst_56 : f32 to vector<16x64xf32>
    %134 = arith.subf %116, %133 : vector<16x64xf32>
    %135 = math.tanh %134 : vector<16x64xf32>
    %136 = arith.mulf %135, %135 : vector<16x64xf32>
    %cst_57 = arith.constant 1.000000e+00 : f32
    %137 = vector.broadcast %cst_57 : f32 to vector<16x64xf32>
    %138 = arith.subf %137, %136 : vector<16x64xf32>
    %139 = arith.truncf %138 : vector<16x64xf32> to vector<16x64xbf16>
    %c0_58 = arith.constant 0 : index
    %c128_59 = arith.constant 128 : index
    %140 = vector.load %arg9[%c0_58, %c128_59] : memref<16x512xbf16, #tpu.memory_space<vmem>>, vector<16x64xbf16>
    tpu.vector_store %arg9[%c0_58, %c128_59], %139 {strides = array<i32>} : memref<16x512xbf16, #tpu.memory_space<vmem>>, vector<16x64xbf16>,
    %cst_60 = arith.constant -0.0857142359 : f32
    %141 = vector.broadcast %cst_60 : f32 to vector<16x64xf32>
    %142 = arith.subf %116, %141 : vector<16x64xf32>
    %143 = math.tanh %142 : vector<16x64xf32>
    %144 = arith.mulf %143, %143 : vector<16x64xf32>
    %cst_61 = arith.constant 1.000000e+00 : f32
    %145 = vector.broadcast %cst_61 : f32 to vector<16x64xf32>
    %146 = arith.subf %145, %144 : vector<16x64xf32>
    %147 = arith.truncf %146 : vector<16x64xf32> to vector<16x64xbf16>
    %c0_62 = arith.constant 0 : index
    %c192_63 = arith.constant 192 : index
    %148 = vector.load %arg9[%c0_62, %c192_63] : memref<16x512xbf16, #tpu.memory_space<vmem>>, vector<16x64xbf16>
    tpu.vector_store %arg9[%c0_62, %c192_63], %147 {strides = array<i32>} : memref<16x512xbf16, #tpu.memory_space<vmem>>, vector<16x64xbf16>,
    %cst_64 = arith.constant 0.0857143402 : f32
    %149 = vector.broadcast %cst_64 : f32 to vector<16x64xf32>
    %150 = arith.subf %116, %149 : vector<16x64xf32>
    %151 = math.tanh %150 : vector<16x64xf32>
    %152 = arith.mulf %151, %151 : vector<16x64xf32>
    %cst_65 = arith.constant 1.000000e+00 : f32
    %153 = vector.broadcast %cst_65 : f32 to vector<16x64xf32>
    %154 = arith.subf %153, %152 : vector<16x64xf32>
    %155 = arith.truncf %154 : vector<16x64xf32> to vector<16x64xbf16>
    %c0_66 = arith.constant 0 : index
    %c256 = arith.constant 256 : index
    %156 = vector.load %arg9[%c0_66, %c256] : memref<16x512xbf16, #tpu.memory_space<vmem>>, vector<16x64xbf16>
    tpu.vector_store %arg9[%c0_66, %c256], %155 {strides = array<i32>} : memref<16x512xbf16, #tpu.memory_space<vmem>>, vector<16x64xbf16>,
    %cst_67 = arith.constant 0.257142901 : f32
    %157 = vector.broadcast %cst_67 : f32 to vector<16x64xf32>
    %158 = arith.subf %116, %157 : vector<16x64xf32>
    %159 = math.tanh %158 : vector<16x64xf32>
    %160 = arith.mulf %159, %159 : vector<16x64xf32>
    %cst_68 = arith.constant 1.000000e+00 : f32
    %161 = vector.broadcast %cst_68 : f32 to vector<16x64xf32>
    %162 = arith.subf %161, %160 : vector<16x64xf32>
    %163 = arith.truncf %162 : vector<16x64xf32> to vector<16x64xbf16>
    %c0_69 = arith.constant 0 : index
    %c320 = arith.constant 320 : index
    %164 = vector.load %arg9[%c0_69, %c320] : memref<16x512xbf16, #tpu.memory_space<vmem>>, vector<16x64xbf16>
    tpu.vector_store %arg9[%c0_69, %c320], %163 {strides = array<i32>} : memref<16x512xbf16, #tpu.memory_space<vmem>>, vector<16x64xbf16>,
    %cst_70 = arith.constant 0.428571522 : f32
    %165 = vector.broadcast %cst_70 : f32 to vector<16x64xf32>
    %166 = arith.subf %116, %165 : vector<16x64xf32>
    %167 = math.tanh %166 : vector<16x64xf32>
    %168 = arith.mulf %167, %167 : vector<16x64xf32>
    %cst_71 = arith.constant 1.000000e+00 : f32
    %169 = vector.broadcast %cst_71 : f32 to vector<16x64xf32>
    %170 = arith.subf %169, %168 : vector<16x64xf32>
    %171 = arith.truncf %170 : vector<16x64xf32> to vector<16x64xbf16>
    %c0_72 = arith.constant 0 : index
    %c384 = arith.constant 384 : index
    %172 = vector.load %arg9[%c0_72, %c384] : memref<16x512xbf16, #tpu.memory_space<vmem>>, vector<16x64xbf16>
    tpu.vector_store %arg9[%c0_72, %c384], %171 {strides = array<i32>} : memref<16x512xbf16, #tpu.memory_space<vmem>>, vector<16x64xbf16>,
    %cst_73 = arith.constant 6.000000e-01 : f32
    %173 = vector.broadcast %cst_73 : f32 to vector<16x64xf32>
    %174 = arith.subf %116, %173 : vector<16x64xf32>
    %175 = math.tanh %174 : vector<16x64xf32>
    %176 = arith.mulf %175, %175 : vector<16x64xf32>
    %cst_74 = arith.constant 1.000000e+00 : f32
    %177 = vector.broadcast %cst_74 : f32 to vector<16x64xf32>
    %178 = arith.subf %177, %176 : vector<16x64xf32>
    %179 = arith.truncf %178 : vector<16x64xf32> to vector<16x64xbf16>
    %c0_75 = arith.constant 0 : index
    %c448 = arith.constant 448 : index
    %180 = vector.load %arg9[%c0_75, %c448] : memref<16x512xbf16, #tpu.memory_space<vmem>>, vector<16x64xbf16>
    tpu.vector_store %arg9[%c0_75, %c448], %179 {strides = array<i32>} : memref<16x512xbf16, #tpu.memory_space<vmem>>, vector<16x64xbf16>,
    %c0_76 = arith.constant 0 : index
    %c0_77 = arith.constant 0 : index
    %181 = vector.load %arg9[%c0_76, %c0_77] : memref<16x512xbf16, #tpu.memory_space<vmem>>, vector<16x512xbf16>
    %c0_78 = arith.constant 0 : index
    %c0_79 = arith.constant 0 : index
    %182 = vector.load %arg7[%c0_78, %c0_79] : memref<512x128xbf16, #tpu.memory_space<vmem>>, vector<512x128xbf16>
    %cst_80 = arith.constant dense<0.000000e+00> : vector<16x128xf32>
    %183 = tpu.matmul %181, %182, %cst_80 {dimension_numbers = #tpu.dot_dimension_numbers<[1], [0], [0], [1], [0, 0, 1, 1], [], []>} : vector<16x512xbf16>, vector<512x128xbf16>, vector<16x128xf32> -> vector<16x128xf32>
    %c0_81 = arith.constant 0 : index
    %c0_82 = arith.constant 0 : index
    %184 = vector.load %arg8[%c0_81, %c0_82] : memref<16x128xf32, #tpu.memory_space<vmem>>, vector<16x128xf32>
    tpu.vector_store %arg8[%c0_81, %c0_82], %183 {strides = array<i32>} : memref<16x128xf32, #tpu.memory_space<vmem>>, vector<16x128xf32>,
    return
  }
  func.func @transform_0(%arg0: i32) -> (i32, i32) {
    %c0_i32 = arith.constant 0 : i32
    %c0_i32_0 = arith.constant 0 : i32
    return %arg0, %c0_i32 : i32, i32
  }
  func.func @transform_1(%arg0: i32) -> (i32, i32) {
    %c0_i32 = arith.constant 0 : i32
    %c0_i32_0 = arith.constant 0 : i32
    %c0_i32_1 = arith.constant 0 : i32
    return %c0_i32, %c0_i32_0 : i32, i32
  }
  func.func @transform_2(%arg0: i32) -> (i32, i32) {
    %c0_i32 = arith.constant 0 : i32
    %c0_i32_0 = arith.constant 0 : i32
    %c0_i32_1 = arith.constant 0 : i32
    return %c0_i32, %c0_i32_0 : i32, i32
  }
  func.func @transform_3(%arg0: i32) -> (i32, i32) {
    %c0_i32 = arith.constant 0 : i32
    %c0_i32_0 = arith.constant 0 : i32
    %c0_i32_1 = arith.constant 0 : i32
    return %c0_i32, %c0_i32_0 : i32, i32
  }
  func.func @transform_4(%arg0: i32) -> (i32, i32) {
    %c0_i32 = arith.constant 0 : i32
    %c0_i32_0 = arith.constant 0 : i32
    %c0_i32_1 = arith.constant 0 : i32
    return %c0_i32, %c0_i32_0 : i32, i32
  }
  func.func @transform_5(%arg0: i32) -> (i32, i32) {
    %c0_i32 = arith.constant 0 : i32
    %c0_i32_0 = arith.constant 0 : i32
    %c0_i32_1 = arith.constant 0 : i32
    return %c0_i32, %c0_i32_0 : i32, i32
  }
  func.func @transform_6(%arg0: i32) -> (i32, i32) {
    %c0_i32 = arith.constant 0 : i32
    %c0_i32_0 = arith.constant 0 : i32
    %c0_i32_1 = arith.constant 0 : i32
    return %c0_i32, %c0_i32_0 : i32, i32
  }
  func.func @transform_7(%arg0: i32) -> (i32, i32) {
    %c0_i32 = arith.constant 0 : i32
    %c0_i32_0 = arith.constant 0 : i32
    return %arg0, %c0_i32 : i32, i32
  }
}

</mosaic_0001>

<bundles_post_ra>
// kernel: tpu_custom_call.1
= control target key start
LH: loop header
LB: loop body
LE: loop exit
PB: predicated region body
PF: predicated region fallthrough
CT: control target
= control target key end

     0   :  { %12 = vsyncpa [#allocation4], 0  ;;  %s1416_s0 = inlined_call_operand.hbm [shape: f32[16,32], index: 0, kind: input, shape index: {}]   ;;  %s1417_s1 = inlined_call_operand.vmem [shape: f32[1,32], index: 1, kind: input, shape index: {}]   ;;  %s1418_s2 = inlined_call_operand.vmem [shape: f32[1,32], index: 2, kind: input, shape index: {}]   ;;  %s1419_s3 = inlined_call_operand.hbm [shape: bf16[256,128], index: 3, kind: input, shape index: {}]   ;;  %s1420_s4 = inlined_call_operand.vmem [shape: f32[1,64], index: 4, kind: input, shape index: {}]   ;;  %s1421_s5 = inlined_call_operand.vmem [shape: f32[1,64], index: 5, kind: input, shape index: {}]   ;;  %s1422_s6 = inlined_call_operand.hbm [shape: bf16[512,128], index: 6, kind: input, shape index: {}]   ;;  %s1423_s7 = inlined_call_operand.hbm [shape: f32[16,128], index: 7, kind: output, shape index: {}]  }
   0x1   :  { %13 = vsyncpa [#allocation7], 0 }
   0x2   :  { %14 = vsyncpa [#allocation5], 0  ;;  %s1274_s24 = smov [#allocation6]   ;;  %s1180_s28 = scalar_lea.hbm %s1419_s3, 2048 }
   0x3   :  { %s36_s25 = sshll.u32 %s1274_s24, 4  ;;  %p1181_p0 = scmp.ne.s32.totalorder %s1419_s3, %s1180_s28  ;;  %s37_s25 = int_to_ptr.vmem [resolvable:$true] %s36_s25 }
   0x4   :  { %p1184_p1 = scmp.lt.u32.totalorder %s1180_s28, %s1419_s3 }
   0x6   :  { %p1186_p2 = pnand %p1184_p1, %p1181_p0 }
   0x8   :  { %1189 = shalt.err (!%p1186_p2)
}
   0x9   :  { %s1190_s10 = scalar_lea.vmem %s37_s25, 2048  ;;  %p1195_p4 = scmp.lt.s32.totalorder %s37_s25, %s37_s25 }
   0xa   :  { %p1191_p3 = scmp.ne.s32.totalorder %s37_s25, %s1190_s10  ;;  %p1196_p5 = scmp.lt.s32.totalorder %s1190_s10, %s1190_s10 }
   0xc   :  { %p1197_p6 = por %p1196_p5, %p1195_p4 }
   0xe   :  { %p1198_p7 = pnand %p1197_p6, %p1191_p3 }
  0x10   :  { %1201 = shalt.err (!%p1198_p7)
}
  0x11   :  { %s1275_s11 = smov 64   ;;  %s1276_s12 = smov 4  }
  0x12   :  { %42 = dma.hbm_to_vmem [thread:$0]  %s1419_s3, 2048, %s37_s25, [#allocation7], %s1275_s11, %s1275_s11, %s1276_s12  }
  0x13   :  { %s1277_s15 = smov [#allocation3]   ;;  %s1202_s19 = scalar_lea.hbm %s1416_s0, 256 }
  0x14   :  { %s20_s16 = sshll.u32 %s1277_s15, 4  ;;  %p1203_p8 = scmp.ne.s32.totalorder %s1416_s0, %s1202_s19  ;;  %s21_s16 = int_to_ptr.vmem [resolvable:$true] %s20_s16 }
  0x15   :  { %p1206_p9 = scmp.lt.u32.totalorder %s1202_s19, %s1416_s0 }
  0x17   :  { %p1208_p10 = pnand %p1206_p9, %p1203_p8 }
  0x19   :  { %1211 = shalt.err (!%p1208_p10)
}
  0x1a   :  { %s1212_s24 = scalar_lea.vmem %s21_s16, 256  ;;  %p1217_p12 = scmp.lt.s32.totalorder %s21_s16, %s21_s16 }
  0x1b   :  { %p1213_p11 = scmp.ne.s32.totalorder %s21_s16, %s1212_s24  ;;  %p1218_p13 = scmp.lt.s32.totalorder %s1212_s24, %s1212_s24 }
  0x1d   :  { %p1219_p0 = por %p1218_p13, %p1217_p12 }
  0x1f   :  { %p1220_p1 = pnand %p1219_p0, %p1213_p11 }
  0x21   :  { %1223 = shalt.err (!%p1220_p1)
}
  0x22   :  { %s1278_s3 = smov 128   ;;  %s1279_s25 = smov 8  }
  0x23   :  { %26 = dma.hbm_to_vmem [thread:$0]  %s1416_s0, 256, %s21_s16, [#allocation4], %s1278_s3, %s1278_s3, %s1279_s25  }
  0x24   :  { %s1280_s28 = smov [#allocation8]   ;;  %s1224_s9 = scalar_lea.hbm %s1422_s6, 4096 }
  0x25   :  { %s52_s29 = sshll.u32 %s1280_s28, 4  ;;  %p1225_p2 = scmp.ne.s32.totalorder %s1422_s6, %s1224_s9  ;;  %s53_s29 = int_to_ptr.vmem [resolvable:$true] %s52_s29 }
  0x26   :  { %p1228_p3 = scmp.lt.u32.totalorder %s1224_s9, %s1422_s6 }
  0x28   :  { %p1230_p4 = pnand %p1228_p3, %p1225_p2 }
  0x2a   :  { %1233 = shalt.err (!%p1230_p4)
}
  0x2b   :  { %s1234_s17 = scalar_lea.vmem %s53_s29, 4096  ;;  %p1239_p6 = scmp.lt.s32.totalorder %s53_s29, %s53_s29 }
  0x2c   :  { %p1235_p5 = scmp.ne.s32.totalorder %s53_s29, %s1234_s17  ;;  %p1240_p7 = scmp.lt.s32.totalorder %s1234_s17, %s1234_s17 }
  0x2e   :  { %p1241_p8 = por %p1240_p7, %p1239_p6 }
  0x30   :  { %p1242_p9 = pnand %p1241_p8, %p1235_p5 }
  0x32   :  { %1245 = shalt.err (!%p1242_p9)
}
  0x33   :  { %58 = dma.hbm_to_vmem [thread:$0]  %s1422_s6, 4096, %s53_s29, [#allocation7], %s1275_s11, %s1275_s11, %s1276_s12  }
  0x34   :  { %1268 = dma.done.wait [#allocation4], 256  }
  0x35   :  { %1269 = vsyncadd [#allocation4], 4294967040 }
  0x36   :  { %1270 = dma.done.wait [#allocation7], 6144  }
  0x37   :  { %1271 = vsyncadd [#allocation7], 4294961152  ;;  %vm73_vm0 = vcmask 261120   ;;  %v69_v0 = vld [vmem:[#allocation3] sm:$0xff]  ;;  %v70_v1 = vld [vmem:[#allocation3 + $0x8] sm:$0xff]  ;;  %vm140_vm1 = vcmask 523520  }
  0x38   :  { %v74_v2 = vsel %vm73_vm0, %v69_v0, 0.0  ;;  %v77_v3 = vsel %vm73_vm0, %v70_v1, 0.0  ;;  %v1060_v14 = vld [vmem:[#allocation6 + $0x40] sm:$0xff]   ;;  %v1062_v16 = vld [vmem:[#allocation6 + $0x48] sm:$0xff]   ;;  %v1064_v18 = vld [vmem:[#allocation6 + $0x50] sm:$0xff]   ;;  %vm155_vm2 = vcmask 785920  }
  0x39   :  { %75 = vadd.xlane.f32.xlu0 %v74_v2  ;;  %v1061_v15 = vld [vmem:[#allocation6] sm:$0xff]   ;;  %984 = vmatprep.subr.bf16.mxu0 %v1060_v14  ;;  %v1063_v17 = vld [vmem:[#allocation6 + $0x8] sm:$0xff]   ;;  %v1065_v19 = vld [vmem:[#allocation6 + $0x10] sm:$0xff]   ;;  %vm170_vm3 = vcmask 1048320   ;;  %vm397_vm4 = vcmask 523264   ;;  %vm464_vm5 = vcmask 1048064  }
  0x3a   :  { %985 = vmatpush3.bf16.msra.mxu0 %v1061_v15  ;;  %v900_v27 = vld [vmem:[%s1417_s1] ss:$0 sm:$0xff]  ;;  %v1066_v50 = vld [vmem:[#allocation6 + $0x58] sm:$0xff]   ;;  %v1068_v61 = vld [vmem:[#allocation6 + $0x60] sm:$0xff]   ;;  %s1281_s1 = smov 32  }
  0x3b   :  { %986 = vmatprep.subr.bf16.mxu0 %v1062_v16  ;;  %v901_v29 = vld [vmem:[%s1418_s2] ss:$0 sm:$0xff]  ;;  %v1067_v51 = vld [vmem:[#allocation6 + $0x18] sm:$0xff]   ;;  %v1069_v62 = vld [vmem:[#allocation6 + $0x20] sm:$0xff]   ;;  %s1282_s2 = smov 96  }
  0x3d   :  { %78 = vadd.xlane.f32.xlu0 %v77_v3 }
  0x3e   :  { %987 = vmatpush3.bf16.msra.mxu0 %v1063_v17 }
  0x3f   :  { %988 = vmatprep.subr.bf16.mxu0 %v1064_v18 }
  0x42   :  { %989 = vmatpush3.bf16.msra.mxu0 %v1065_v19 }
  0x43   :  { %990 = vmatprep.subr.bf16.mxu0 %v1066_v50 }
  0x46   :  { %991 = vmatpush3.bf16.msra.mxu0 %v1067_v51 }
  0x47   :  { %992 = vmatprep.subr.bf16.mxu0 %v1068_v61 }
  0x4a   :  { %993 = vmatpush3.bf16.msra.mxu0 %v1069_v62 }
  0xc6   :  { %v76_v4 = vpop.xlane.xlu0 %75 }
  0xc7   :  { %v81_v5 = vmul.f32 0.03125, %v76_v4 }
  0xc9   :  { %v83_v6 = vsub.f32 %v69_v0, %v81_v5 }
  0xca   :  { %v79_v7 = vpop.xlane.xlu0 %78 }
  0xcb   :  { %v82_v8 = vmul.f32 0.03125, %v79_v7  ;;  %v85_v9 = vmul.f32 %v83_v6, %v83_v6 }
  0xcd   :  { %v84_v10 = vsub.f32 %v70_v1, %v82_v8  ;;  %v87_v11 = vsel %vm73_vm0, %v85_v9, 0.0  ;;  %v1070_v8 = vld [vmem:[#allocation6 + $0x68] sm:$0xff]  }
  0xce   :  { %88 = vadd.xlane.f32.xlu1 %v87_v11  ;;  %v1071_v9 = vld [vmem:[#allocation6 + $0x28] sm:$0xff]   ;;  %994 = vmatprep.subr.bf16.mxu0 %v1070_v8 }
  0xcf   :  { %v86_v12 = vmul.f32 %v84_v10, %v84_v10  ;;  %995 = vmatpush3.bf16.msra.mxu0 %v1071_v9 }
  0xd1   :  { %v90_v13 = vsel %vm73_vm0, %v86_v12, 0.0 }
  0xd2   :  { %91 = vadd.xlane.f32.xlu1 %v90_v13 }
 0x15b   :  { %v89_v20 = vpop.xlane.xlu1 %88 }
 0x15c   :  { %v93_v21 = vmul.f32 0.03125, %v89_v20 }
 0x15e   :  { %v95_v22 = vadd.f32 1e-05, %v93_v21 }
 0x15f   :  { %v92_v23 = vpop.xlane.xlu1 %91 }
 0x160   :  { %1108 = vrsqrt.f32 %v95_v22  ;;  %v94_v24 = vmul.f32 0.03125, %v92_v23 }
 0x162   :  { %v96_v25 = vadd.f32 1e-05, %v94_v24 }
 0x164   :  { %1110 = vrsqrt.f32 %v96_v25  ;;  %v1072_v25 = vld [vmem:[#allocation6 + $0x70] sm:$0xff]  }
 0x165   :  { %996 = vmatprep.subr.bf16.mxu0 %v1072_v25  ;;  %v1087_v25 = vld [vmem:[#allocation8 + $0xd0] sm:$0xff]  }
 0x16a   :  { %v1109_v26 = vpop.eup %1108 }
 0x16b   :  { %v99_v28 = vmul.f32 %v1109_v26, %v83_v6  ;;  %v1073_v26 = vld [vmem:[#allocation6 + $0x30] sm:$0xff]  }
 0x16c   :  { %997 = vmatpush3.bf16.msra.mxu0 %v1073_v26  ;;  %v1084_v26 = vld [vmem:[#allocation8 + $0x10] sm:$0xff]  }
 0x16d   :  { %v107_v30 = vmul.f32 %v900_v27, %v99_v28 }
 0x16e   :  { %v1111_v31 = vpop.eup %1110 }
 0x16f   :  { %v115_v32 = vadd.f32 %v901_v29, %v107_v30  ;;  %v100_v33 = vmul.f32 %v1111_v31, %v84_v10 }
 0x171   :  { %v108_v34 = vmul.f32 %v900_v27, %v100_v33  ;;  %v912_v35 = vadd.f32 -0.2571429, %v115_v32  ;;  %v904_v36 = vadd.f32 0.42857143, %v115_v32  ;;  %v916_v37 = vadd.f32 -0.6, %v115_v32 }
 0x172   :  { %v914_v38 = vadd.f32 -0.42857152, %v115_v32  ;;  %v906_v44 = vadd.f32 0.25714287, %v115_v32  ;;  %v908_v46 = vadd.f32 0.085714236, %v115_v32 }
 0x173   :  { %v116_v39 = vadd.f32 %v901_v29, %v108_v34  ;;  %1112 = vtanh.f32 %v912_v35  ;;  %v910_v48 = vadd.f32 -0.08571434, %v115_v32  ;;  %v902_v53 = vadd.f32 0.6, %v115_v32  ;;  %v1074_v29 = vld [vmem:[#allocation6 + $0x78] sm:$0xff]  }
 0x174   :  { %1114 = vtanh.f32 %v904_v36  ;;  %998 = vmatprep.subr.bf16.mxu0 %v1074_v29  ;;  %v1091_v29 = vld [vmem:[#allocation8 + $0xd8] sm:$0xff]  }
 0x175   :  { %v913_v40 = vadd.f32 -0.2571429, %v116_v39  ;;  %v905_v41 = vadd.f32 0.42857143, %v116_v39  ;;  %v917_v42 = vadd.f32 -0.6, %v116_v39  ;;  %1116 = vtanh.f32 %v916_v37 }
 0x176   :  { %v915_v43 = vadd.f32 -0.42857152, %v116_v39  ;;  %1118 = vtanh.f32 %v914_v38  ;;  %v907_v45 = vadd.f32 0.25714287, %v116_v39  ;;  %v909_v47 = vadd.f32 0.085714236, %v116_v39 }
 0x177   :  { %1120 = vtanh.f32 %v913_v40  ;;  %v911_v49 = vadd.f32 -0.08571434, %v116_v39  ;;  %v903_v55 = vadd.f32 0.6, %v116_v39 }
 0x178   :  { %1122 = vtanh.f32 %v905_v41  ;;  %v1075_v41 = vld [vmem:[#allocation6 + $0x38] sm:$0xff]  }
 0x179   :  { %1124 = vtanh.f32 %v917_v42  ;;  %999 = vmatpush3.bf16.msra.mxu0 %v1075_v41  ;;  %v934_v41 = vld [vmem:[%s1420_s4] ss:$0 sm:$0xff]  ;;  %s1283_s4 = smov [#allocation9]  }
 0x17a   :  { %1126 = vtanh.f32 %v915_v43 }
 0x17b   :  { %1128 = vtanh.f32 %v906_v44 }
 0x17c   :  { %1130 = vtanh.f32 %v907_v45 }
 0x17d   :  { %v1113_v52 = vpop.eup %1112  ;;  %1132 = vtanh.f32 %v908_v46 }
 0x17e   :  { %v1115_v54 = vpop.eup %1114  ;;  %1134 = vtanh.f32 %v909_v47  ;;  %v186_v58 = vmul.f32 %v1113_v52, %v1113_v52 }
 0x17f   :  { %v1117_v56 = vpop.eup %1116  ;;  %1136 = vtanh.f32 %v910_v48  ;;  %v131_v60 = vmul.f32 %v1115_v54, %v1115_v54 }
 0x180   :  { %v1119_v57 = vpop.eup %1118  ;;  %1138 = vtanh.f32 %v911_v49  ;;  %v188_v4 = vsub.f32 1.0, %v186_v58  ;;  %v214_v6 = vmul.f32 %v1117_v56, %v1117_v56 }
 0x181   :  { %v1121_v59 = vpop.eup %1120  ;;  %1140 = vtanh.f32 %v902_v53  ;;  %v133_v11 = vsub.f32 1.0, %v131_v60  ;;  %v200_v13 = vmul.f32 %v1119_v57, %v1119_v57 }
 0x182   :  { %v1123_v63 = vpop.eup %1122  ;;  %v187_v0 = vmul.f32 %v1121_v59, %v1121_v59  ;;  %1142 = vtanh.f32 %v903_v55  ;;  %v216_v23 = vsub.f32 1.0, %v214_v6 }
 0x183   :  { %v1125_v1 = vpop.eup %1124  ;;  %v132_v2 = vmul.f32 %v1123_v63, %v1123_v63  ;;  %v202_v28 = vsub.f32 1.0, %v200_v13 }
 0x184   :  { %v1127_v3 = vpop.eup %1126  ;;  %v189_v5 = vsub.f32 1.0, %v187_v0  ;;  %v215_v7 = vmul.f32 %v1125_v1, %v1125_v1 }
 0x185   :  { %v1129_v10 = vpop.eup %1128  ;;  %v134_v12 = vsub.f32 1.0, %v132_v2  ;;  %v201_v14 = vmul.f32 %v1127_v3, %v1127_v3 }
 0x186   :  { %v1131_v15 = vpop.eup %1130  ;;  %v190_v16 = vpack.c.bf16 %v189_v5, %v188_v4  ;;  %v217_v17 = vsub.f32 1.0, %v215_v7  ;;  %v146_v24 = vmul.f32 %v1129_v10, %v1129_v10 }
 0x187   :  { %v1133_v18 = vpop.eup %1132  ;;  %v135_v19 = vpack.c.bf16 %v134_v12, %v133_v11  ;;  %v203_v20 = vsub.f32 1.0, %v201_v14  ;;  %v147_v21 = vmul.f32 %v1131_v15, %v1131_v15 }
 0x188   :  { %v1135_v22 = vpop.eup %1134  ;;  %192 = vrot.lane.b32.xlu0 %v190_v16, %s1281_s1  ;;  %v218_v31 = vpack.c.bf16 %v217_v17, %v216_v23  ;;  %v148_v39 = vsub.f32 1.0, %v146_v24  ;;  %v161_v42 = vmul.f32 %v1133_v18, %v1133_v18  ;;  %v1076_v16 = vld [vmem:[#allocation8 + $0x40] sm:$0xff]   ;;  %v1078_v18 = vld [vmem:[#allocation8 + $0x48] sm:$0xff]   ;;  %v1082_v23 = vld [vmem:[#allocation8 + $0x50] sm:$0xff]  }
 0x189   :  { %v1137_v27 = vpop.eup %1136  ;;  %137 = vrot.lane.b32.xlu1 %v135_v19, %s1281_s1  ;;  %v149_v32 = vsub.f32 1.0, %v147_v21  ;;  %v204_v35 = vpack.c.bf16 %v203_v20, %v202_v28  ;;  %v162_v36 = vmul.f32 %v1135_v22, %v1135_v22  ;;  %v1077_v17 = vld [vmem:[#allocation8] sm:$0xff]   ;;  %1006 = vmatprep.subr.bf16.mxu1 %v1076_v16  ;;  %v1083_v21 = vld [vmem:[#allocation8 + $0xc8] sm:$0xff]   ;;  %v1089_v28 = vld [vmem:[#allocation8 + $0x90] sm:$0xff]  }
 0x18a   :  { %v1139_v30 = vpop.eup %1138  ;;  %v176_v33 = vmul.f32 %v1137_v27, %v1137_v27  ;;  %v163_v51 = vsub.f32 1.0, %v161_v42  ;;  %v1079_v19 = vld [vmem:[#allocation8 + $0xc0] sm:$0xff]   ;;  %1007 = vmatpush3.bf16.msra.mxu1 %v1077_v17  ;;  %v1080_v22 = vld [vmem:[#allocation8 + $0x8] sm:$0xff]   ;;  %v1086_v27 = vld [vmem:[#allocation8 + $0x58] sm:$0xff]  }
 0x18b   :  { %v1141_v34 = vpop.eup %1140  ;;  %v177_v37 = vmul.f32 %v1139_v30, %v1139_v30  ;;  %v150_v46 = vpack.c.bf16 %v149_v32, %v148_v39  ;;  %v164_v47 = vsub.f32 1.0, %v162_v36  ;;  %v1081_v20 = vld [vmem:[#allocation8 + $0x80] sm:$0xff]   ;;  %1028 = vmatprep.subr.bf16.mxu0 %v1079_v19  ;;  %1008 = vmatprep.subr.bf16.mxu1 %v1078_v18  ;;  %v1085_v24 = vld [vmem:[#allocation8 + $0x88] sm:$0xff]   ;;  %v1088_v30 = vld [vmem:[#allocation8 + $0x18] sm:$0xff]  }
 0x18c   :  { %v1143_v38 = vpop.eup %1142  ;;  %220 = vrot.lane.b32.xlu0 %v218_v31, %s1282_s2  ;;  %v121_v40 = vmul.f32 %v1141_v34, %v1141_v34  ;;  %v178_v43 = vsub.f32 1.0, %v176_v33  ;;  %v1090_v31 = vld [vmem:[#allocation8 + $0x60] sm:$0xff]   ;;  %v1093_v32 = vld [vmem:[#allocation8 + $0x98] sm:$0xff]  }
 0x18d   :  { %206 = vrot.lane.b32.xlu1 %v204_v35, %s1275_s11  ;;  %v179_v44 = vsub.f32 1.0, %v177_v37  ;;  %v122_v45 = vmul.f32 %v1143_v38, %v1143_v38  ;;  %v165_v53 = vpack.c.bf16 %v164_v47, %v163_v51  ;;  %v1092_v33 = vld [vmem:[#allocation8 + $0x20] sm:$0xff]  }
 0x18e   :  { %v123_v49 = vsub.f32 1.0, %v121_v40  ;;  %1009 = vmatpush3.bf16.msra.mxu1 %v1080_v22 }
 0x18f   :  { %v180_v48 = vpack.c.bf16 %v179_v44, %v178_v43  ;;  %v124_v50 = vsub.f32 1.0, %v122_v45  ;;  %1010 = vmatprep.subr.bf16.mxu1 %v1082_v23  ;;  %v935_v43 = vld [vmem:[%s1421_s5] ss:$0 sm:$0xff]  ;;  %s887_s5 = sshll.u32 %s1283_s4, 4  ;;  %s888_s5 = int_to_ptr.vmem [resolvable:$true] %s887_s5 }
 0x190   :  { %p1251_p11 = scmp.lt.s32.totalorder %s888_s5, %s888_s5 }
 0x191   :  { %152 = vrot.lane.b32.xlu1 %v150_v46, %s1275_s11  ;;  %181 = vst.msk [vmem:[#allocation2 + $0x8] sm:$0xff] %vm73_vm0, %v180_v48  ;;  %v125_v52 = vpack.c.bf16 %v124_v50, %v123_v49 }
 0x192   :  { %1011 = vmatpush3.bf16.msra.mxu1 %v1084_v26 }
 0x193   :  { %126 = vst.msk [vmem:[#allocation2] sm:$0xff] %vm73_vm0, %v125_v52  ;;  %1012 = vmatprep.subr.bf16.mxu1 %v1086_v27  ;;  %v1103_v27 = vld [vmem:[#allocation8 + $0xf0] sm:$0xff]  }
 0x195   :  { %167 = vrot.lane.b32.xlu1 %v165_v53, %s1282_s2 }
 0x196   :  { %1013 = vmatpush3.bf16.msra.mxu1 %v1088_v30 }
 0x197   :  { %1014 = vmatprep.subr.bf16.mxu1 %v1090_v31 }
 0x19a   :  { %1015 = vmatpush3.bf16.msra.mxu1 %v1092_v33 }
 0x1fa   :  { %v193_v54 = vpop.permute.xlu0 %192 }
 0x1fb   :  { %195 = vst.msk [vmem:[#allocation2 + $0x8] sm:$0xff] %vm140_vm1, %v193_v54  ;;  %v138_v55 = vpop.permute.xlu1 %137 }
 0x1fc   :  { %141 = vst.msk [vmem:[#allocation2] sm:$0xff] %vm140_vm1, %v138_v55 }
 0x1fe   :  { %v221_v56 = vpop.permute.xlu0 %220 }
 0x1ff   :  { %v207_v57 = vpop.permute.xlu1 %206 }
 0x200   :  { %209 = vst.msk [vmem:[#allocation2 + $0x8] sm:$0xff] %vm155_vm2, %v207_v57 }
 0x201   :  { %223 = vst.msk [vmem:[#allocation2 + $0x8] sm:$0xff] %vm170_vm3, %v221_v56 }
 0x203   :  { %v153_v58 = vpop.permute.xlu1 %152 }
 0x204   :  { %156 = vst.msk [vmem:[#allocation2] sm:$0xff] %vm155_vm2, %v153_v58 }
 0x207   :  { %v168_v59 = vpop.permute.xlu1 %167 }
 0x208   :  { %171 = vst.msk [vmem:[#allocation2] sm:$0xff] %vm170_vm3, %v168_v59  ;;  %v225_v60 = vld [vmem:[#allocation2 + $0x8] sm:$0xff] }
 0x209   :  { %386 = vmatprep.mubr.bf16.mxu0 %v225_v60 }
 0x20f   :  { %v224_v61 = vld [vmem:[#allocation2] sm:$0xff] }
 0x210   :  { %387 = vmatmul.mubr.bf16.vlgmr.msra.gmra.mrb[0].mxu0 %v224_v61 }
 0x211   :  { %1029 = vmatpush3.bf16.msra.mxu0 %v1081_v20 }
 0x212   :  { %1030 = vmatprep.subr.bf16.mxu0 %v1083_v21  ;;  %v1102_v21 = vld [vmem:[#allocation8 + $0x78] sm:$0xff]  }
 0x215   :  { %1031 = vmatpush3.bf16.msra.mxu0 %v1085_v24 }
 0x216   :  { %1032 = vmatprep.subr.bf16.mxu0 %v1087_v25 }
 0x219   :  { %1033 = vmatpush3.bf16.msra.mxu0 %v1089_v28  ;;  %v1104_v28 = vld [vmem:[#allocation8 + $0x38] sm:$0xff]  }
 0x21a   :  { %1034 = vmatprep.subr.bf16.mxu0 %v1091_v29  ;;  %v1105_v29 = vld [vmem:[#allocation8 + $0xb0] sm:$0xff]  }
 0x21d   :  { %1035 = vmatpush3.bf16.msra.mxu0 %v1093_v32 }
 0x2e3   :  { %v1000_v62 = vpop.f32.mrb[0].mxu0 }
 0x2e4   :  { %v1001_v63 = vpop.f32.mrb[1].mxu0 }
 0x2e5   :  { %v1002_v0 = vadd.f32 %v1001_v63, %v1000_v62  ;;  %v1003_v1 = vpop.f32.mrb[2].mxu0  ;;  %v1094_v63 = vld [vmem:[#allocation8 + $0x68] sm:$0xff]  }
 0x2e6   :  { %v1004_v2 = vpop.f32.mrb[3].mxu0  ;;  %1016 = vmatprep.subr.bf16.mxu1 %v1094_v63 }
 0x2e7   :  { %v1005_v3 = vadd.f32 %v1004_v2, %v1003_v1  ;;  %v398_v4 = vsel %vm397_vm4, %v1002_v0, 0.0  ;;  %v1096_v1 = vld [vmem:[#allocation8 + $0x28] sm:$0xff]  }
 0x2e8   :  { %399 = vadd.xlane.f32.xlu0 %v398_v4  ;;  %v1097_v4 = vld [vmem:[#allocation8 + $0xa0] sm:$0xff]   ;;  %1017 = vmatpush3.bf16.msra.mxu1 %v1096_v1 }
 0x2e9   :  { %v401_v5 = vsel %vm397_vm4, %v1005_v3, 0.0 }
 0x2ea   :  { %402 = vadd.xlane.f32.xlu1 %v401_v5 }
 0x375   :  { %v400_v6 = vpop.xlane.xlu0 %399 }
 0x376   :  { %v405_v7 = vmul.f32 0.015625, %v400_v6 }
 0x377   :  { %v403_v8 = vpop.xlane.xlu1 %402 }
 0x378   :  { %v407_v9 = vsub.f32 %v1002_v0, %v405_v7  ;;  %v406_v10 = vmul.f32 0.015625, %v403_v8  ;;  %v1095_v0 = vld [vmem:[#allocation8 + $0xe0] sm:$0xff]  }
 0x379   :  { %1036 = vmatprep.subr.bf16.mxu0 %v1095_v0 }
 0x37a   :  { %v408_v11 = vsub.f32 %v1005_v3, %v406_v10  ;;  %v409_v12 = vmul.f32 %v407_v9, %v407_v9  ;;  %1037 = vmatpush3.bf16.msra.mxu0 %v1097_v4  ;;  %v1099_v10 = vld [vmem:[#allocation8 + $0xe8] sm:$0xff]  }
 0x37b   :  { %1038 = vmatprep.subr.bf16.mxu0 %v1099_v10 }
 0x37c   :  { %v411_v13 = vsel %vm397_vm4, %v409_v12, 0.0  ;;  %v410_v14 = vmul.f32 %v408_v11, %v408_v11 }
 0x37d   :  { %412 = vadd.xlane.f32.xlu0 %v411_v13 }
 0x37e   :  { %v414_v15 = vsel %vm397_vm4, %v410_v14, 0.0  ;;  %v1101_v14 = vld [vmem:[#allocation8 + $0xa8] sm:$0xff]  }
 0x37f   :  { %1039 = vmatpush3.bf16.msra.mxu0 %v1101_v14 }
 0x380   :  { %1040 = vmatprep.subr.bf16.mxu0 %v1103_v27 }
 0x381   :  { %415 = vadd.xlane.f32.xlu0 %v414_v15 }
 0x383   :  { %1041 = vmatpush3.bf16.msra.mxu0 %v1105_v29 }
 0x40a   :  { %v413_v34 = vpop.xlane.xlu0 %412 }
 0x40b   :  { %v417_v35 = vmul.f32 0.015625, %v413_v34 }
 0x40d   :  { %v419_v36 = vadd.f32 1e-05, %v417_v35 }
 0x40e   :  { %v416_v37 = vpop.xlane.xlu0 %415 }
 0x40f   :  { %1144 = vrsqrt.f32 %v419_v36  ;;  %v418_v38 = vmul.f32 0.015625, %v416_v37 }
 0x411   :  { %v420_v39 = vadd.f32 1e-05, %v418_v38 }
 0x413   :  { %1146 = vrsqrt.f32 %v420_v39 }
 0x419   :  { %v1145_v40 = vpop.eup %1144 }
 0x41a   :  { %v423_v42 = vmul.f32 %v1145_v40, %v407_v9  ;;  %v1098_v9 = vld [vmem:[#allocation8 + $0x70] sm:$0xff]  }
 0x41b   :  { %1018 = vmatprep.subr.bf16.mxu1 %v1098_v9 }
 0x41c   :  { %v431_v44 = vmul.f32 %v934_v41, %v423_v42  ;;  %v1107_v42 = vld [vmem:[#allocation8 + $0xb8] sm:$0xff]  }
 0x41d   :  { %v1147_v45 = vpop.eup %1146 }
 0x41e   :  { %v439_v46 = vadd.f32 %v935_v43, %v431_v44  ;;  %v424_v47 = vmul.f32 %v1147_v45, %v408_v11  ;;  %v1100_v11 = vld [vmem:[#allocation8 + $0x30] sm:$0xff]  }
 0x41f   :  { %1019 = vmatpush3.bf16.msra.mxu1 %v1100_v11 }
 0x420   :  { %v432_v48 = vmul.f32 %v934_v41, %v424_v47  ;;  %v950_v49 = vadd.f32 -0.6, %v439_v46  ;;  %v942_v50 = vadd.f32 0.085714236, %v439_v46  ;;  %v938_v51 = vadd.f32 0.42857143, %v439_v46  ;;  %1020 = vmatprep.subr.bf16.mxu1 %v1102_v21 }
 0x421   :  { %v946_v52 = vadd.f32 -0.2571429, %v439_v46  ;;  %v948_v58 = vadd.f32 -0.42857152, %v439_v46  ;;  %v940_v60 = vadd.f32 0.25714287, %v439_v46 }
 0x422   :  { %v440_v53 = vadd.f32 %v935_v43, %v432_v48  ;;  %1148 = vtanh.f32 %v950_v49  ;;  %v936_v62 = vadd.f32 0.6, %v439_v46  ;;  %v944_v5 = vadd.f32 -0.08571434, %v439_v46  ;;  %v1106_v41 = vld [vmem:[#allocation8 + $0xf8] sm:$0xff]  }
 0x423   :  { %1150 = vtanh.f32 %v942_v50  ;;  %1021 = vmatpush3.bf16.msra.mxu1 %v1104_v28  ;;  %1042 = vmatprep.subr.bf16.mxu0 %v1106_v41 }
 0x424   :  { %v951_v54 = vadd.f32 -0.6, %v440_v53  ;;  %v943_v55 = vadd.f32 0.085714236, %v440_v53  ;;  %v939_v56 = vadd.f32 0.42857143, %v440_v53  ;;  %1152 = vtanh.f32 %v938_v51  ;;  %1043 = vmatpush3.bf16.msra.mxu0 %v1107_v42 }
 0x425   :  { %v947_v57 = vadd.f32 -0.2571429, %v440_v53  ;;  %1154 = vtanh.f32 %v946_v52  ;;  %v949_v59 = vadd.f32 -0.42857152, %v440_v53  ;;  %v941_v61 = vadd.f32 0.25714287, %v440_v53 }
 0x426   :  { %1156 = vtanh.f32 %v951_v54  ;;  %v937_v2 = vadd.f32 0.6, %v440_v53  ;;  %v945_v7 = vadd.f32 -0.08571434, %v440_v53 }
 0x427   :  { %1158 = vtanh.f32 %v943_v55 }
 0x428   :  { %1160 = vtanh.f32 %v939_v56 }
 0x429   :  { %1162 = vtanh.f32 %v947_v57 }
 0x42a   :  { %1164 = vtanh.f32 %v948_v58 }
 0x42b   :  { %1166 = vtanh.f32 %v949_v59 }
 0x42c   :  { %v1149_v3 = vpop.eup %1148  ;;  %1168 = vtanh.f32 %v940_v60 }
 0x42d   :  { %v1151_v6 = vpop.eup %1150  ;;  %1170 = vtanh.f32 %v941_v61  ;;  %v528_v13 = vmul.f32 %v1149_v3, %v1149_v3 }
 0x42e   :  { %v1153_v8 = vpop.eup %1152  ;;  %1172 = vtanh.f32 %v936_v62  ;;  %v480_v16 = vmul.f32 %v1151_v6, %v1151_v6 }
 0x42f   :  { %v1155_v12 = vpop.eup %1154  ;;  %1174 = vtanh.f32 %v937_v2  ;;  %v530_v23 = vsub.f32 1.0, %v528_v13  ;;  %v455_v25 = vmul.f32 %v1153_v8, %v1153_v8 }
 0x430   :  { %v1157_v15 = vpop.eup %1156  ;;  %1176 = vtanh.f32 %v944_v5  ;;  %v482_v31 = vsub.f32 1.0, %v480_v16  ;;  %v504_v45 = vmul.f32 %v1155_v12, %v1155_v12 }
 0x431   :  { %v1159_v17 = vpop.eup %1158  ;;  %v529_v18 = vmul.f32 %v1157_v15, %v1157_v15  ;;  %1178 = vtanh.f32 %v945_v7  ;;  %v457_v44 = vsub.f32 1.0, %v455_v25 }
 0x432   :  { %v1161_v19 = vpop.eup %1160  ;;  %v481_v20 = vmul.f32 %v1159_v17, %v1159_v17  ;;  %v506_v61 = vsub.f32 1.0, %v504_v45 }
 0x433   :  { %v1163_v22 = vpop.eup %1162  ;;  %v531_v24 = vsub.f32 1.0, %v529_v18  ;;  %v456_v26 = vmul.f32 %v1161_v19, %v1161_v19 }
 0x434   :  { %v1165_v30 = vpop.eup %1164  ;;  %v483_v32 = vsub.f32 1.0, %v481_v20  ;;  %v505_v36 = vmul.f32 %v1163_v22, %v1163_v22 }
 0x435   :  { %v1167_v33 = vpop.eup %1166  ;;  %v532_v34 = vpack.c.bf16 %v531_v24, %v530_v23  ;;  %v458_v35 = vsub.f32 1.0, %v456_v26  ;;  %v518_v37 = vmul.f32 %v1165_v30, %v1165_v30 }
 0x436   :  { %v1169_v38 = vpop.eup %1168  ;;  %v484_v39 = vpack.c.bf16 %v483_v32, %v482_v31  ;;  %v519_v40 = vmul.f32 %v1167_v33, %v1167_v33  ;;  %v507_v53 = vsub.f32 1.0, %v505_v36 }
 0x437   :  { %v1171_v43 = vpop.eup %1170  ;;  %534 = vrot.lane.b32.xlu1 %v532_v34, %s1275_s11  ;;  %v470_v46 = vmul.f32 %v1169_v38, %v1169_v38  ;;  %v520_v48 = vsub.f32 1.0, %v518_v37  ;;  %v459_v52 = vpack.c.bf16 %v458_v35, %v457_v44 }
 0x438   :  { %v1173_v47 = vpop.eup %1172  ;;  %486 = vrot.lane.b32.xlu0 %v484_v39, %s1275_s11  ;;  %v521_v49 = vsub.f32 1.0, %v519_v40  ;;  %v471_v50 = vmul.f32 %v1171_v43, %v1171_v43  ;;  %v508_v3 = vpack.c.bf16 %v507_v53, %v506_v61 }
 0x439   :  { %v1175_v51 = vpop.eup %1174  ;;  %v445_v54 = vmul.f32 %v1173_v47, %v1173_v47  ;;  %v472_v57 = vsub.f32 1.0, %v470_v46 }
 0x43a   :  { %v1177_v55 = vpop.eup %1176  ;;  %v522_v56 = vpack.c.bf16 %v521_v49, %v520_v48  ;;  %v473_v58 = vsub.f32 1.0, %v471_v50  ;;  %v446_v59 = vmul.f32 %v1175_v51, %v1175_v51 }
 0x43b   :  { %v1179_v60 = vpop.eup %1178  ;;  %461 = vrot.lane.b32.xlu1 %v459_v52, %s1275_s11  ;;  %v494_v62 = vmul.f32 %v1177_v55, %v1177_v55  ;;  %v447_v0 = vsub.f32 1.0, %v445_v54 }
 0x43c   :  { %523 = vst.msk [vmem:[#allocation2 + $0x18] sm:$0xff] %vm397_vm4, %v522_v56  ;;  %v474_v63 = vpack.c.bf16 %v473_v58, %v472_v57  ;;  %v448_v1 = vsub.f32 1.0, %v446_v59  ;;  %v495_v2 = vmul.f32 %v1179_v60, %v1179_v60 }
 0x43d   :  { %v496_v5 = vsub.f32 1.0, %v494_v62 }
 0x43e   :  { %475 = vst.msk [vmem:[#allocation2 + $0x8] sm:$0xff] %vm397_vm4, %v474_v63  ;;  %v449_v4 = vpack.c.bf16 %v448_v1, %v447_v0  ;;  %v497_v6 = vsub.f32 1.0, %v495_v2 }
 0x43f   :  { %510 = vrot.lane.b32.xlu1 %v508_v3, %s1275_s11  ;;  %s1246_s11 = scalar_lea.vmem %s888_s5, 256 }
 0x440   :  { %450 = vst.msk [vmem:[#allocation2] sm:$0xff] %vm397_vm4, %v449_v4  ;;  %v498_v7 = vpack.c.bf16 %v497_v6, %v496_v5  ;;  %p1247_p10 = scmp.ne.s32.totalorder %s888_s5, %s1246_s11  ;;  %p1252_p12 = scmp.lt.s32.totalorder %s1246_s11, %s1246_s11 }
 0x442   :  { %499 = vst.msk [vmem:[#allocation2 + $0x10] sm:$0xff] %vm397_vm4, %v498_v7  ;;  %p1253_p13 = por %p1252_p12, %p1251_p11 }
 0x444   :  { %p1254_p0 = pnand %p1253_p13, %p1247_p10 }
 0x4a9   :  { %v535_v8 = vpop.permute.xlu1 %534 }
 0x4aa   :  { %537 = vst.msk [vmem:[#allocation2 + $0x18] sm:$0xff] %vm464_vm5, %v535_v8  ;;  %v487_v9 = vpop.permute.xlu0 %486 }
 0x4ab   :  { %489 = vst.msk [vmem:[#allocation2 + $0x8] sm:$0xff] %vm464_vm5, %v487_v9 }
 0x4ad   :  { %v462_v10 = vpop.permute.xlu1 %461 }
 0x4ae   :  { %465 = vst.msk [vmem:[#allocation2] sm:$0xff] %vm464_vm5, %v462_v10 }
 0x4b1   :  { %v511_v11 = vpop.permute.xlu1 %510  ;;  %v541_v12 = vld [vmem:[#allocation2 + $0x18] sm:$0xff] }
 0x4b2   :  { %513 = vst.msk [vmem:[#allocation2 + $0x10] sm:$0xff] %vm464_vm5, %v511_v11  ;;  %v539_v13 = vld [vmem:[#allocation2 + $0x8] sm:$0xff]  ;;  %871 = vmatprep.mubr.bf16.mxu0 %v541_v12 }
 0x4b3   :  { %830 = vmatprep.mubr.bf16.mxu1 %v539_v13 }
 0x4b5   :  { %v538_v14 = vld [vmem:[#allocation2] sm:$0xff] }
 0x4b6   :  { %831 = vmatmul.mubr.bf16.vlgmr.msra.gmra.mrb[0].mxu1 %v538_v14 }
 0x4b9   :  { %v540_v15 = vld [vmem:[#allocation2 + $0x10] sm:$0xff] }
 0x4ba   :  { %872 = vmatmul.mubr.bf16.vlgmr.msra.gmra.mrb[4].mxu0 %v540_v15 }
 0x589   :  { %v1022_v16 = vpop.f32.mrb[0].mxu1 }
 0x58a   :  { %v1023_v17 = vpop.f32.mrb[1].mxu1 }
 0x58b   :  { %v1024_v18 = vadd.f32 %v1023_v17, %v1022_v16  ;;  %v1025_v19 = vpop.f32.mrb[2].mxu1 }
 0x58c   :  { %v1026_v20 = vpop.f32.mrb[3].mxu1 }
 0x58d   :  { %v1027_v21 = vadd.f32 %v1026_v20, %v1025_v19  ;;  %v1044_v22 = vpop.f32.mrb[4].mxu0 }
 0x58e   :  { %v1045_v23 = vpop.f32.mrb[5].mxu0 }
 0x58f   :  { %v1046_v24 = vadd.f32 %v1045_v23, %v1044_v22  ;;  %v1047_v25 = vpop.f32.mrb[6].mxu0 }
 0x590   :  { %v1048_v26 = vpop.f32.mrb[7].mxu0 }
 0x591   :  { %v874_v27 = vadd.f32 %v1046_v24, %v1024_v18  ;;  %v1049_v28 = vadd.f32 %v1048_v26, %v1047_v25 }
 0x593   :  { %880 = vst [vmem:[#allocation9] sm:$0xff] %v874_v27  ;;  %v877_v29 = vadd.f32 %v1049_v28, %v1027_v21 }
 0x595   :  { %881 = vst [vmem:[#allocation9 + $0x8] sm:$0xff] %v877_v29 }
 0x596   :  { %1257 = shalt.err (!%p1254_p0)
}
 0x597   :  { %s1258_s27 = scalar_lea.hbm %s1423_s7, 256 }
 0x598   :  { %p1259_p1 = scmp.ne.s32.totalorder %s1423_s7, %s1258_s27  ;;  %p1262_p2 = scmp.lt.u32.totalorder %s1258_s27, %s1423_s7 }
 0x59a   :  { %p1264_p3 = pnand %p1262_p2, %p1259_p1 }
 0x59c   :  { %1267 = shalt.err (!%p1264_p3)
}
 0x59d   :  { %893 = dma.vmem_to_hbm [thread:$0]  %s888_s5, 256, %s1423_s7, [#allocation5], %s1278_s3, %s1278_s3, %s1279_s25  }
 0x59e   :  { %1272 = dma.done.wait [#allocation5], 256  }
 0x59f   :  { %1273 = vsyncadd [#allocation5], 4294967040 }
 0x5a0   :  { %897 = vsyncpa [#allocation4], 1 }
 0x5a1   :  { %898 = vsyncpa [#allocation7], 1 }
 0x5a2   :  { %899 = vsyncpa [#allocation5], 1 }

// kernel: tpu_custom_call.1
= control target key start
LH: loop header
LB: loop body
LE: loop exit
PB: predicated region body
PF: predicated region fallthrough
CT: control target
= control target key end

     0   :  { %12 = vsyncpa [#allocation4], 0  ;;  %s1416_s0 = inlined_call_operand.hbm [shape: f32[16,32], index: 0, kind: input, shape index: {}]   ;;  %s1417_s1 = inlined_call_operand.vmem [shape: f32[1,32], index: 1, kind: input, shape index: {}]   ;;  %s1418_s2 = inlined_call_operand.vmem [shape: f32[1,32], index: 2, kind: input, shape index: {}]   ;;  %s1419_s3 = inlined_call_operand.hbm [shape: bf16[256,128], index: 3, kind: input, shape index: {}]   ;;  %s1420_s4 = inlined_call_operand.vmem [shape: f32[1,64], index: 4, kind: input, shape index: {}]   ;;  %s1421_s5 = inlined_call_operand.vmem [shape: f32[1,64], index: 5, kind: input, shape index: {}]   ;;  %s1422_s6 = inlined_call_operand.hbm [shape: bf16[512,128], index: 6, kind: input, shape index: {}]   ;;  %s1423_s7 = inlined_call_operand.hbm [shape: f32[16,128], index: 7, kind: output, shape index: {}]  }
   0x1   :  { %13 = vsyncpa [#allocation7], 0 }
   0x2   :  { %14 = vsyncpa [#allocation5], 0  ;;  %s1274_s24 = smov [#allocation6]   ;;  %s1180_s28 = scalar_lea.hbm %s1419_s3, 2048 }
   0x3   :  { %s36_s25 = sshll.u32 %s1274_s24, 4  ;;  %p1181_p0 = scmp.ne.s32.totalorder %s1419_s3, %s1180_s28  ;;  %s37_s25 = int_to_ptr.vmem [resolvable:$true] %s36_s25 }
   0x4   :  { %p1184_p1 = scmp.lt.u32.totalorder %s1180_s28, %s1419_s3 }
   0x6   :  { %p1186_p2 = pnand %p1184_p1, %p1181_p0 }
   0x8   :  { %1189 = shalt.err (!%p1186_p2)
}
   0x9   :  { %s1190_s10 = scalar_lea.vmem %s37_s25, 2048  ;;  %p1195_p4 = scmp.lt.s32.totalorder %s37_s25, %s37_s25 }
   0xa   :  { %p1191_p3 = scmp.ne.s32.totalorder %s37_s25, %s1190_s10  ;;  %p1196_p5 = scmp.lt.s32.totalorder %s1190_s10, %s1190_s10 }
   0xc   :  { %p1197_p6 = por %p1196_p5, %p1195_p4 }
   0xe   :  { %p1198_p7 = pnand %p1197_p6, %p1191_p3 }
  0x10   :  { %1201 = shalt.err (!%p1198_p7)
}
  0x11   :  { %s1275_s11 = smov 64   ;;  %s1276_s12 = smov 4  }
  0x12   :  { %42 = dma.hbm_to_vmem [thread:$0]  %s1419_s3, 2048, %s37_s25, [#allocation7], %s1275_s11, %s1275_s11, %s1276_s12  }
  0x13   :  { %s1277_s15 = smov [#allocation3]   ;;  %s1202_s19 = scalar_lea.hbm %s1416_s0, 256 }
  0x14   :  { %s20_s16 = sshll.u32 %s1277_s15, 4  ;;  %p1203_p8 = scmp.ne.s32.totalorder %s1416_s0, %s1202_s19  ;;  %s21_s16 = int_to_ptr.vmem [resolvable:$true] %s20_s16 }
  0x15   :  { %p1206_p9 = scmp.lt.u32.totalorder %s1202_s19, %s1416_s0 }
  0x17   :  { %p1208_p10 = pnand %p1206_p9, %p1203_p8 }
  0x19   :  { %1211 = shalt.err (!%p1208_p10)
}
  0x1a   :  { %s1212_s24 = scalar_lea.vmem %s21_s16, 256  ;;  %p1217_p12 = scmp.lt.s32.totalorder %s21_s16, %s21_s16 }
  0x1b   :  { %p1213_p11 = scmp.ne.s32.totalorder %s21_s16, %s1212_s24  ;;  %p1218_p13 = scmp.lt.s32.totalorder %s1212_s24, %s1212_s24 }
  0x1d   :  { %p1219_p0 = por %p1218_p13, %p1217_p12 }
  0x1f   :  { %p1220_p1 = pnand %p1219_p0, %p1213_p11 }
  0x21   :  { %1223 = shalt.err (!%p1220_p1)
}
  0x22   :  { %s1278_s3 = smov 128   ;;  %s1279_s25 = smov 8  }
  0x23   :  { %26 = dma.hbm_to_vmem [thread:$0]  %s1416_s0, 256, %s21_s16, [#allocation4], %s1278_s3, %s1278_s3, %s1279_s25  }
  0x24   :  { %s1280_s28 = smov [#allocation8]   ;;  %s1224_s9 = scalar_lea.hbm %s1422_s6, 4096 }
  0x25   :  { %s52_s29 = sshll.u32 %s1280_s28, 4  ;;  %p1225_p2 = scmp.ne.s32.totalorder %s1422_s6, %s1224_s9  ;;  %s53_s29 = int_to_ptr.vmem [resolvable:$true] %s52_s29 }
  0x26   :  { %p1228_p3 = scmp.lt.u32.totalorder %s1224_s9, %s1422_s6 }
  0x28   :  { %p1230_p4 = pnand %p1228_p3, %p1225_p2 }
  0x2a   :  { %1233 = shalt.err (!%p1230_p4)
}
  0x2b   :  { %s1234_s17 = scalar_lea.vmem %s53_s29, 4096  ;;  %p1239_p6 = scmp.lt.s32.totalorder %s53_s29, %s53_s29 }
  0x2c   :  { %p1235_p5 = scmp.ne.s32.totalorder %s53_s29, %s1234_s17  ;;  %p1240_p7 = scmp.lt.s32.totalorder %s1234_s17, %s1234_s17 }
  0x2e   :  { %p1241_p8 = por %p1240_p7, %p1239_p6 }
  0x30   :  { %p1242_p9 = pnand %p1241_p8, %p1235_p5 }
  0x32   :  { %1245 = shalt.err (!%p1242_p9)
}
  0x33   :  { %58 = dma.hbm_to_vmem [thread:$0]  %s1422_s6, 4096, %s53_s29, [#allocation7], %s1275_s11, %s1275_s11, %s1276_s12  }
  0x34   :  { %1268 = dma.done.wait [#allocation4], 256  }
  0x35   :  { %1269 = vsyncadd [#allocation4], 4294967040 }
  0x36   :  { %1270 = dma.done.wait [#allocation7], 6144  }
  0x37   :  { %1271 = vsyncadd [#allocation7], 4294961152  ;;  %vm73_vm0 = vcmask 261120   ;;  %v69_v0 = vld [vmem:[#allocation3] sm:$0xff]  ;;  %v70_v1 = vld [vmem:[#allocation3 + $0x8] sm:$0xff]  ;;  %vm140_vm1 = vcmask 523520  }
  0x38   :  { %v74_v2 = vsel %vm73_vm0, %v69_v0, 0.0  ;;  %v77_v3 = vsel %vm73_vm0, %v70_v1, 0.0  ;;  %v1060_v14 = vld [vmem:[#allocation6 + $0x40] sm:$0xff]   ;;  %v1062_v16 = vld [vmem:[#allocation6 + $0x48] sm:$0xff]   ;;  %v1064_v18 = vld [vmem:[#allocation6 + $0x50] sm:$0xff]   ;;  %vm155_vm2 = vcmask 785920  }
  0x39   :  { %75 = vadd.xlane.f32.xlu0 %v74_v2  ;;  %v1061_v15 = vld [vmem:[#allocation6] sm:$0xff]   ;;  %984 = vmatprep.subr.bf16.mxu0 %v1060_v14  ;;  %v1063_v17 = vld [vmem:[#allocation6 + $0x8] sm:$0xff]   ;;  %v1065_v19 = vld [vmem:[#allocation6 + $0x10] sm:$0xff]   ;;  %vm170_vm3 = vcmask 1048320   ;;  %vm397_vm4 = vcmask 523264   ;;  %vm464_vm5 = vcmask 1048064  }
  0x3a   :  { %985 = vmatpush3.bf16.msra.mxu0 %v1061_v15  ;;  %v900_v27 = vld [vmem:[%s1417_s1] ss:$0 sm:$0xff]  ;;  %v1066_v50 = vld [vmem:[#allocation6 + $0x58] sm:$0xff]   ;;  %v1068_v61 = vld [vmem:[#allocation6 + $0x60] sm:$0xff]   ;;  %s1281_s1 = smov 32  }
  0x3b   :  { %986 = vmatprep.subr.bf16.mxu0 %v1062_v16  ;;  %v901_v29 = vld [vmem:[%s1418_s2] ss:$0 sm:$0xff]  ;;  %v1067_v51 = vld [vmem:[#allocation6 + $0x18] sm:$0xff]   ;;  %v1069_v62 = vld [vmem:[#allocation6 + $0x20] sm:$0xff]   ;;  %s1282_s2 = smov 96  }
  0x3d   :  { %78 = vadd.xlane.f32.xlu0 %v77_v3 }
  0x3e   :  { %987 = vmatpush3.bf16.msra.mxu0 %v1063_v17 }
  0x3f   :  { %988 = vmatprep.subr.bf16.mxu0 %v1064_v18 }
  0x42   :  { %989 = vmatpush3.bf16.msra.mxu0 %v1065_v19 }
  0x43   :  { %990 = vmatprep.subr.bf16.mxu0 %v1066_v50 }
  0x46   :  { %991 = vmatpush3.bf16.msra.mxu0 %v1067_v51 }
  0x47   :  { %992 = vmatprep.subr.bf16.mxu0 %v1068_v61 }
  0x4a   :  { %993 = vmatpush3.bf16.msra.mxu0 %v1069_v62 }
  0xc6   :  { %v76_v4 = vpop.xlane.xlu0 %75 }
  0xc7   :  { %v81_v5 = vmul.f32 0.03125, %v76_v4 }
  0xc9   :  { %v83_v6 = vsub.f32 %v69_v0, %v81_v5 }
  0xca   :  { %v79_v7 = vpop.xlane.xlu0 %78 }
  0xcb   :  { %v82_v8 = vmul.f32 0.03125, %v79_v7  ;;  %v85_v9 = vmul.f32 %v83_v6, %v83_v6 }
  0xcd   :  { %v84_v10 = vsub.f32 %v70_v1, %v82_v8  ;;  %v87_v11 = vsel %vm73_vm0, %v85_v9, 0.0  ;;  %v1070_v8 = vld [vmem:[#allocation6 + $0x68] sm:$0xff]  }
  0xce   :  { %88 = vadd.xlane.f32.xlu1 %v87_v11  ;;  %v1071_v9 = vld [vmem:[#allocation6 + $0x28] sm:$0xff]   ;;  %994 = vmatprep.subr.bf16.mxu0 %v1070_v8 }
  0xcf   :  { %v86_v12 = vmul.f32 %v84_v10, %v84_v10  ;;  %995 = vmatpush3.bf16.msra.mxu0 %v1071_v9 }
  0xd1   :  { %v90_v13 = vsel %vm73_vm0, %v86_v12, 0.0 }
  0xd2   :  { %91 = vadd.xlane.f32.xlu1 %v90_v13 }
 0x15b   :  { %v89_v20 = vpop.xlane.xlu1 %88 }
 0x15c   :  { %v93_v21 = vmul.f32 0.03125, %v89_v20 }
 0x15e   :  { %v95_v22 = vadd.f32 1e-05, %v93_v21 }
 0x15f   :  { %v92_v23 = vpop.xlane.xlu1 %91 }
 0x160   :  { %1108 = vrsqrt.f32 %v95_v22  ;;  %v94_v24 = vmul.f32 0.03125, %v92_v23 }
 0x162   :  { %v96_v25 = vadd.f32 1e-05, %v94_v24 }
 0x164   :  { %1110 = vrsqrt.f32 %v96_v25  ;;  %v1072_v25 = vld [vmem:[#allocation6 + $0x70] sm:$0xff]  }
 0x165   :  { %996 = vmatprep.subr.bf16.mxu0 %v1072_v25  ;;  %v1087_v25 = vld [vmem:[#allocation8 + $0xd0] sm:$0xff]  }
 0x16a   :  { %v1109_v26 = vpop.eup %1108 }
 0x16b   :  { %v99_v28 = vmul.f32 %v1109_v26, %v83_v6  ;;  %v1073_v26 = vld [vmem:[#allocation6 + $0x30] sm:$0xff]  }
 0x16c   :  { %997 = vmatpush3.bf16.msra.mxu0 %v1073_v26  ;;  %v1084_v26 = vld [vmem:[#allocation8 + $0x10] sm:$0xff]  }
 0x16d   :  { %v107_v30 = vmul.f32 %v900_v27, %v99_v28 }
 0x16e   :  { %v1111_v31 = vpop.eup %1110 }
 0x16f   :  { %v115_v32 = vadd.f32 %v901_v29, %v107_v30  ;;  %v100_v33 = vmul.f32 %v1111_v31, %v84_v10 }
 0x171   :  { %v108_v34 = vmul.f32 %v900_v27, %v100_v33  ;;  %v912_v35 = vadd.f32 -0.2571429, %v115_v32  ;;  %v904_v36 = vadd.f32 0.42857143, %v115_v32  ;;  %v916_v37 = vadd.f32 -0.6, %v115_v32 }
 0x172   :  { %v914_v38 = vadd.f32 -0.42857152, %v115_v32  ;;  %v906_v44 = vadd.f32 0.25714287, %v115_v32  ;;  %v908_v46 = vadd.f32 0.085714236, %v115_v32 }
 0x173   :  { %v116_v39 = vadd.f32 %v901_v29, %v108_v34  ;;  %1112 = vtanh.f32 %v912_v35  ;;  %v910_v48 = vadd.f32 -0.08571434, %v115_v32  ;;  %v902_v53 = vadd.f32 0.6, %v115_v32  ;;  %v1074_v29 = vld [vmem:[#allocation6 + $0x78] sm:$0xff]  }
 0x174   :  { %1114 = vtanh.f32 %v904_v36  ;;  %998 = vmatprep.subr.bf16.mxu0 %v1074_v29  ;;  %v1091_v29 = vld [vmem:[#allocation8 + $0xd8] sm:$0xff]  }
 0x175   :  { %v913_v40 = vadd.f32 -0.2571429, %v116_v39  ;;  %v905_v41 = vadd.f32 0.42857143, %v116_v39  ;;  %v917_v42 = vadd.f32 -0.6, %v116_v39  ;;  %1116 = vtanh.f32 %v916_v37 }
 0x176   :  { %v915_v43 = vadd.f32 -0.42857152, %v116_v39  ;;  %1118 = vtanh.f32 %v914_v38  ;;  %v907_v45 = vadd.f32 0.25714287, %v116_v39  ;;  %v909_v47 = vadd.f32 0.085714236, %v116_v39 }
 0x177   :  { %1120 = vtanh.f32 %v913_v40  ;;  %v911_v49 = vadd.f32 -0.08571434, %v116_v39  ;;  %v903_v55 = vadd.f32 0.6, %v116_v39 }
 0x178   :  { %1122 = vtanh.f32 %v905_v41  ;;  %v1075_v41 = vld [vmem:[#allocation6 + $0x38] sm:$0xff]  }
 0x179   :  { %1124 = vtanh.f32 %v917_v42  ;;  %999 = vmatpush3.bf16.msra.mxu0 %v1075_v41  ;;  %v934_v41 = vld [vmem:[%s1420_s4] ss:$0 sm:$0xff]  ;;  %s1283_s4 = smov [#allocation9]  }
 0x17a   :  { %1126 = vtanh.f32 %v915_v43 }
 0x17b   :  { %1128 = vtanh.f32 %v906_v44 }
 0x17c   :  { %1130 = vtanh.f32 %v907_v45 }
 0x17d   :  { %v1113_v52 = vpop.eup %1112  ;;  %1132 = vtanh.f32 %v908_v46 }
 0x17e   :  { %v1115_v54 = vpop.eup %1114  ;;  %1134 = vtanh.f32 %v909_v47  ;;  %v186_v58 = vmul.f32 %v1113_v52, %v1113_v52 }
 0x17f   :  { %v1117_v56 = vpop.eup %1116  ;;  %1136 = vtanh.f32 %v910_v48  ;;  %v131_v60 = vmul.f32 %v1115_v54, %v1115_v54 }
 0x180   :  { %v1119_v57 = vpop.eup %1118  ;;  %1138 = vtanh.f32 %v911_v49  ;;  %v188_v4 = vsub.f32 1.0, %v186_v58  ;;  %v214_v6 = vmul.f32 %v1117_v56, %v1117_v56 }
 0x181   :  { %v1121_v59 = vpop.eup %1120  ;;  %1140 = vtanh.f32 %v902_v53  ;;  %v133_v11 = vsub.f32 1.0, %v131_v60  ;;  %v200_v13 = vmul.f32 %v1119_v57, %v1119_v57 }
 0x182   :  { %v1123_v63 = vpop.eup %1122  ;;  %v187_v0 = vmul.f32 %v1121_v59, %v1121_v59  ;;  %1142 = vtanh.f32 %v903_v55  ;;  %v216_v23 = vsub.f32 1.0, %v214_v6 }
 0x183   :  { %v1125_v1 = vpop.eup %1124  ;;  %v132_v2 = vmul.f32 %v1123_v63, %v1123_v63  ;;  %v202_v28 = vsub.f32 1.0, %v200_v13 }
 0x184   :  { %v1127_v3 = vpop.eup %1126  ;;  %v189_v5 = vsub.f32 1.0, %v187_v0  ;;  %v215_v7 = vmul.f32 %v1125_v1, %v1125_v1 }
 0x185   :  { %v1129_v10 = vpop.eup %1128  ;;  %v134_v12 = vsub.f32 1.0, %v132_v2  ;;  %v201_v14 = vmul.f32 %v1127_v3, %v1127_v3 }
 0x186   :  { %v1131_v15 = vpop.eup %1130  ;;  %v190_v16 = vpack.c.bf16 %v189_v5, %v188_v4  ;;  %v217_v17 = vsub.f32 1.0, %v215_v7  ;;  %v146_v24 = vmul.f32 %v1129_v10, %v1129_v10 }
 0x187   :  { %v1133_v18 = vpop.eup %1132  ;;  %v135_v19 = vpack.c.bf16 %v134_v12, %v133_v11  ;;  %v203_v20 = vsub.f32 1.0, %v201_v14  ;;  %v147_v21 = vmul.f32 %v1131_v15, %v1131_v15 }
 0x188   :  { %v1135_v22 = vpop.eup %1134  ;;  %192 = vrot.lane.b32.xlu0 %v190_v16, %s1281_s1  ;;  %v218_v31 = vpack.c.bf16 %v217_v17, %v216_v23  ;;  %v148_v39 = vsub.f32 1.0, %v146_v24  ;;  %v161_v42 = vmul.f32 %v1133_v18, %v1133_v18  ;;  %v1076_v16 = vld [vmem:[#allocation8 + $0x40] sm:$0xff]   ;;  %v1078_v18 = vld [vmem:[#allocation8 + $0x48] sm:$0xff]   ;;  %v1082_v23 = vld [vmem:[#allocation8 + $0x50] sm:$0xff]  }
 0x189   :  { %v1137_v27 = vpop.eup %1136  ;;  %137 = vrot.lane.b32.xlu1 %v135_v19, %s1281_s1  ;;  %v149_v32 = vsub.f32 1.0, %v147_v21  ;;  %v204_v35 = vpack.c.bf16 %v203_v20, %v202_v28  ;;  %v162_v36 = vmul.f32 %v1135_v22, %v1135_v22  ;;  %v1077_v17 = vld [vmem:[#allocation8] sm:$0xff]   ;;  %1006 = vmatprep.subr.bf16.mxu1 %v1076_v16  ;;  %v1083_v21 = vld [vmem:[#allocation8 + $0xc8] sm:$0xff]   ;;  %v1089_v28 = vld [vmem:[#allocation8 + $0x90] sm:$0xff]  }
 0x18a   :  { %v1139_v30 = vpop.eup %1138  ;;  %v176_v33 = vmul.f32 %v1137_v27, %v1137_v27  ;;  %v163_v51 = vsub.f32 1.0, %v161_v42  ;;  %v1079_v19 = vld [vmem:[#allocation8 + $0xc0] sm:$0xff]   ;;  %1007 = vmatpush3.bf16.msra.mxu1 %v1077_v17  ;;  %v1080_v22 = vld [vmem:[#allocation8 + $0x8] sm:$0xff]   ;;  %v1086_v27 = vld [vmem:[#allocation8 + $0x58] sm:$0xff]  }
 0x18b   :  { %v1141_v34 = vpop.eup %1140  ;;  %v177_v37 = vmul.f32 %v1139_v30, %v1139_v30  ;;  %v150_v46 = vpack.c.bf16 %v149_v32, %v148_v39  ;;  %v164_v47 = vsub.f32 1.0, %v162_v36  ;;  %v1081_v20 = vld [vmem:[#allocation8 + $0x80] sm:$0xff]   ;;  %1028 = vmatprep.subr.bf16.mxu0 %v1079_v19  ;;  %1008 = vmatprep.subr.bf16.mxu1 %v1078_v18  ;;  %v1085_v24 = vld [vmem:[#allocation8 + $0x88] sm:$0xff]   ;;  %v1088_v30 = vld [vmem:[#allocation8 + $0x18] sm:$0xff]  }
 0x18c   :  { %v1143_v38 = vpop.eup %1142  ;;  %220 = vrot.lane.b32.xlu0 %v218_v31, %s1282_s2  ;;  %v121_v40 = vmul.f32 %v1141_v34, %v1141_v34  ;;  %v178_v43 = vsub.f32 1.0, %v176_v33  ;;  %v1090_v31 = vld [vmem:[#allocation8 + $0x60] sm:$0xff]   ;;  %v1093_v32 = vld [vmem:[#allocation8 + $0x98] sm:$0xff]  }
 0x18d   :  { %206 = vrot.lane.b32.xlu1 %v204_v35, %s1275_s11  ;;  %v179_v44 = vsub.f32 1.0, %v177_v37  ;;  %v122_v45 = vmul.f32 %v1143_v38, %v1143_v38  ;;  %v165_v53 = vpack.c.bf16 %v164_v47, %v163_v51  ;;  %v1092_v33 = vld [vmem:[#allocation8 + $0x20] sm:$0xff]  }
 0x18e   :  { %v123_v49 = vsub.f32 1.0, %v121_v40  ;;  %1009 = vmatpush3.bf16.msra.mxu1 %v1080_v22 }
 0x18f   :  { %v180_v48 = vpack.c.bf16 %v179_v44, %v178_v43  ;;  %v124_v50 = vsub.f32 1.0, %v122_v45  ;;  %1010 = vmatprep.subr.bf16.mxu1 %v1082_v23  ;;  %v935_v43 = vld [vmem:[%s1421_s5] ss:$0 sm:$0xff]  ;;  %s887_s5 = sshll.u32 %s1283_s4, 4  ;;  %s888_s5 = int_to_ptr.vmem [resolvable:$true] %s887_s5 }
 0x190   :  { %p1251_p11 = scmp.lt.s32.totalorder %s888_s5, %s888_s5 }
 0x191   :  { %152 = vrot.lane.b32.xlu1 %v150_v46, %s1275_s11  ;;  %181 = vst.msk [vmem:[#allocation2 + $0x8] sm:$0xff] %vm73_vm0, %v180_v48  ;;  %v125_v52 = vpack.c.bf16 %v124_v50, %v123_v49 }
 0x192   :  { %1011 = vmatpush3.bf16.msra.mxu1 %v1084_v26 }
 0x193   :  { %126 = vst.msk [vmem:[#allocation2] sm:$0xff] %vm73_vm0, %v125_v52  ;;  %1012 = vmatprep.subr.bf16.mxu1 %v1086_v27  ;;  %v1103_v27 = vld [vmem:[#allocation8 + $0xf0] sm:$0xff]  }
 0x195   :  { %167 = vrot.lane.b32.xlu1 %v165_v53, %s1282_s2 }
 0x196   :  { %1013 = vmatpush3.bf16.msra.mxu1 %v1088_v30 }
 0x197   :  { %1014 = vmatprep.subr.bf16.mxu1 %v1090_v31 }
 0x19a   :  { %1015 = vmatpush3.bf16.msra.mxu1 %v1092_v33 }
 0x1fa   :  { %v193_v54 = vpop.permute.xlu0 %192 }
 0x1fb   :  { %195 = vst.msk [vmem:[#allocation2 + $0x8] sm:$0xff] %vm140_vm1, %v193_v54  ;;  %v138_v55 = vpop.permute.xlu1 %137 }
 0x1fc   :  { %141 = vst.msk [vmem:[#allocation2] sm:$0xff] %vm140_vm1, %v138_v55 }
 0x1fe   :  { %v221_v56 = vpop.permute.xlu0 %220 }
 0x1ff   :  { %v207_v57 = vpop.permute.xlu1 %206 }
 0x200   :  { %209 = vst.msk [vmem:[#allocation2 + $0x8] sm:$0xff] %vm155_vm2, %v207_v57 }
 0x201   :  { %223 = vst.msk [vmem:[#allocation2 + $0x8] sm:$0xff] %vm170_vm3, %v221_v56 }
 0x203   :  { %v153_v58 = vpop.permute.xlu1 %152 }
 0x204   :  { %156 = vst.msk [vmem:[#allocation2] sm:$0xff] %vm155_vm2, %v153_v58 }
 0x207   :  { %v168_v59 = vpop.permute.xlu1 %167 }
 0x208   :  { %171 = vst.msk [vmem:[#allocation2] sm:$0xff] %vm170_vm3, %v168_v59  ;;  %v225_v60 = vld [vmem:[#allocation2 + $0x8] sm:$0xff] }
 0x209   :  { %386 = vmatprep.mubr.bf16.mxu0 %v225_v60 }
 0x20f   :  { %v224_v61 = vld [vmem:[#allocation2] sm:$0xff] }
 0x210   :  { %387 = vmatmul.mubr.bf16.vlgmr.msra.gmra.mrb[0].mxu0 %v224_v61 }
 0x211   :  { %1029 = vmatpush3.bf16.msra.mxu0 %v1081_v20 }
 0x212   :  { %1030 = vmatprep.subr.bf16.mxu0 %v1083_v21  ;;  %v1102_v21 = vld [vmem:[#allocation8 + $0x78] sm:$0xff]  }
 0x215   :  { %1031 = vmatpush3.bf16.msra.mxu0 %v1085_v24 }
 0x216   :  { %1032 = vmatprep.subr.bf16.mxu0 %v1087_v25 }
 0x219   :  { %1033 = vmatpush3.bf16.msra.mxu0 %v1089_v28  ;;  %v1104_v28 = vld [vmem:[#allocation8 + $0x38] sm:$0xff]  }
 0x21a   :  { %1034 = vmatprep.subr.bf16.mxu0 %v1091_v29  ;;  %v1105_v29 = vld [vmem:[#allocation8 + $0xb0] sm:$0xff]  }
 0x21d   :  { %1035 = vmatpush3.bf16.msra.mxu0 %v1093_v32 }
 0x2e3   :  { %v1000_v62 = vpop.f32.mrb[0].mxu0 }
 0x2e4   :  { %v1001_v63 = vpop.f32.mrb[1].mxu0 }
 0x2e5   :  { %v1002_v0 = vadd.f32 %v1001_v63, %v1000_v62  ;;  %v1003_v1 = vpop.f32.mrb[2].mxu0  ;;  %v1094_v63 = vld [vmem:[#allocation8 + $0x68] sm:$0xff]  }
 0x2e6   :  { %v1004_v2 = vpop.f32.mrb[3].mxu0  ;;  %1016 = vmatprep.subr.bf16.mxu1 %v1094_v63 }
 0x2e7   :  { %v1005_v3 = vadd.f32 %v1004_v2, %v1003_v1  ;;  %v398_v4 = vsel %vm397_vm4, %v1002_v0, 0.0  ;;  %v1096_v1 = vld [vmem:[#allocation8 + $0x28] sm:$0xff]  }
 0x2e8   :  { %399 = vadd.xlane.f32.xlu0 %v398_v4  ;;  %v1097_v4 = vld [vmem:[#allocation8 + $0xa0] sm:$0xff]   ;;  %1017 = vmatpush3.bf16.msra.mxu1 %v1096_v1 }
 0x2e9   :  { %v401_v5 = vsel %vm397_vm4, %v1005_v3, 0.0 }
 0x2ea   :  { %402 = vadd.xlane.f32.xlu1 %v401_v5 }
 0x375   :  { %v400_v6 = vpop.xlane.xlu0 %399 }
 0x376   :  { %v405_v7 = vmul.f32 0.015625, %v400_v6 }
 0x377   :  { %v403_v8 = vpop.xlane.xlu1 %402 }
 0x378   :  { %v407_v9 = vsub.f32 %v1002_v0, %v405_v7  ;;  %v406_v10 = vmul.f32 0.015625, %v403_v8  ;;  %v1095_v0 = vld [vmem:[#allocation8 + $0xe0] sm:$0xff]  }
 0x379   :  { %1036 = vmatprep.subr.bf16.mxu0 %v1095_v0 }
 0x37a   :  { %v408_v11 = vsub.f32 %v1005_v3, %v406_v10  ;;  %v409_v12 = vmul.f32 %v407_v9, %v407_v9  ;;  %1037 = vmatpush3.bf16.msra.mxu0 %v1097_v4  ;;  %v1099_v10 = vld [vmem:[#allocation8 + $0xe8] sm:$0xff]  }
 0x37b   :  { %1038 = vmatprep.subr.bf16.mxu0 %v1099_v10 }
 0x37c   :  { %v411_v13 = vsel %vm397_vm4, %v409_v12, 0.0  ;;  %v410_v14 = vmul.f32 %v408_v11, %v408_v11 }
 0x37d   :  { %412 = vadd.xlane.f32.xlu0 %v411_v13 }
 0x37e   :  { %v414_v15 = vsel %vm397_vm4, %v410_v14, 0.0  ;;  %v1101_v14 = vld [vmem:[#allocation8 + $0xa8] sm:$0xff]  }
 0x37f   :  { %1039 = vmatpush3.bf16.msra.mxu0 %v1101_v14 }
 0x380   :  { %1040 = vmatprep.subr.bf16.mxu0 %v1103_v27 }
 0x381   :  { %415 = vadd.xlane.f32.xlu0 %v414_v15 }
 0x383   :  { %1041 = vmatpush3.bf16.msra.mxu0 %v1105_v29 }
 0x40a   :  { %v413_v34 = vpop.xlane.xlu0 %412 }
 0x40b   :  { %v417_v35 = vmul.f32 0.015625, %v413_v34 }
 0x40d   :  { %v419_v36 = vadd.f32 1e-05, %v417_v35 }
 0x40e   :  { %v416_v37 = vpop.xlane.xlu0 %415 }
 0x40f   :  { %1144 = vrsqrt.f32 %v419_v36  ;;  %v418_v38 = vmul.f32 0.015625, %v416_v37 }
 0x411   :  { %v420_v39 = vadd.f32 1e-05, %v418_v38 }
 0x413   :  { %1146 = vrsqrt.f32 %v420_v39 }
 0x419   :  { %v1145_v40 = vpop.eup %1144 }
 0x41a   :  { %v423_v42 = vmul.f32 %v1145_v40, %v407_v9  ;;  %v1098_v9 = vld [vmem:[#allocation8 + $0x70] sm:$0xff]  }
 0x41b   :  { %1018 = vmatprep.subr.bf16.mxu1 %v1098_v9 }
 0x41c   :  { %v431_v44 = vmul.f32 %v934_v41, %v423_v42  ;;  %v1107_v42 = vld [vmem:[#allocation8 + $0xb8] sm:$0xff]  }
 0x41d   :  { %v1147_v45 = vpop.eup %1146 }
 0x41e   :  { %v439_v46 = vadd.f32 %v935_v43, %v431_v44  ;;  %v424_v47 = vmul.f32 %v1147_v45, %v408_v11  ;;  %v1100_v11 = vld [vmem:[#allocation8 + $0x30] sm:$0xff]  }
 0x41f   :  { %1019 = vmatpush3.bf16.msra.mxu1 %v1100_v11 }
 0x420   :  { %v432_v48 = vmul.f32 %v934_v41, %v424_v47  ;;  %v950_v49 = vadd.f32 -0.6, %v439_v46  ;;  %v942_v50 = vadd.f32 0.085714236, %v439_v46  ;;  %v938_v51 = vadd.f32 0.42857143, %v439_v46  ;;  %1020 = vmatprep.subr.bf16.mxu1 %v1102_v21 }
 0x421   :  { %v946_v52 = vadd.f32 -0.2571429, %v439_v46  ;;  %v948_v58 = vadd.f32 -0.42857152, %v439_v46  ;;  %v940_v60 = vadd.f32 0.25714287, %v439_v46 }
 0x422   :  { %v440_v53 = vadd.f32 %v935_v43, %v432_v48  ;;  %1148 = vtanh.f32 %v950_v49  ;;  %v936_v62 = vadd.f32 0.6, %v439_v46  ;;  %v944_v5 = vadd.f32 -0.08571434, %v439_v46  ;;  %v1106_v41 = vld [vmem:[#allocation8 + $0xf8] sm:$0xff]  }
 0x423   :  { %1150 = vtanh.f32 %v942_v50  ;;  %1021 = vmatpush3.bf16.msra.mxu1 %v1104_v28  ;;  %1042 = vmatprep.subr.bf16.mxu0 %v1106_v41 }
 0x424   :  { %v951_v54 = vadd.f32 -0.6, %v440_v53  ;;  %v943_v55 = vadd.f32 0.085714236, %v440_v53  ;;  %v939_v56 = vadd.f32 0.42857143, %v440_v53  ;;  %1152 = vtanh.f32 %v938_v51  ;;  %1043 = vmatpush3.bf16.msra.mxu0 %v1107_v42 }
 0x425   :  { %v947_v57 = vadd.f32 -0.2571429, %v440_v53  ;;  %1154 = vtanh.f32 %v946_v52  ;;  %v949_v59 = vadd.f32 -0.42857152, %v440_v53  ;;  %v941_v61 = vadd.f32 0.25714287, %v440_v53 }
 0x426   :  { %1156 = vtanh.f32 %v951_v54  ;;  %v937_v2 = vadd.f32 0.6, %v440_v53  ;;  %v945_v7 = vadd.f32 -0.08571434, %v440_v53 }
 0x427   :  { %1158 = vtanh.f32 %v943_v55 }
 0x428   :  { %1160 = vtanh.f32 %v939_v56 }
 0x429   :  { %1162 = vtanh.f32 %v947_v57 }
 0x42a   :  { %1164 = vtanh.f32 %v948_v58 }
 0x42b   :  { %1166 = vtanh.f32 %v949_v59 }
 0x42c   :  { %v1149_v3 = vpop.eup %1148  ;;  %1168 = vtanh.f32 %v940_v60 }
 0x42d   :  { %v1151_v6 = vpop.eup %1150  ;;  %1170 = vtanh.f32 %v941_v61  ;;  %v528_v13 = vmul.f32 %v1149_v3, %v1149_v3 }
 0x42e   :  { %v1153_v8 = vpop.eup %1152  ;;  %1172 = vtanh.f32 %v936_v62  ;;  %v480_v16 = vmul.f32 %v1151_v6, %v1151_v6 }
 0x42f   :  { %v1155_v12 = vpop.eup %1154  ;;  %1174 = vtanh.f32 %v937_v2  ;;  %v530_v23 = vsub.f32 1.0, %v528_v13  ;;  %v455_v25 = vmul.f32 %v1153_v8, %v1153_v8 }
 0x430   :  { %v1157_v15 = vpop.eup %1156  ;;  %1176 = vtanh.f32 %v944_v5  ;;  %v482_v31 = vsub.f32 1.0, %v480_v16  ;;  %v504_v45 = vmul.f32 %v1155_v12, %v1155_v12 }
 0x431   :  { %v1159_v17 = vpop.eup %1158  ;;  %v529_v18 = vmul.f32 %v1157_v15, %v1157_v15  ;;  %1178 = vtanh.f32 %v945_v7  ;;  %v457_v44 = vsub.f32 1.0, %v455_v25 }
 0x432   :  { %v1161_v19 = vpop.eup %1160  ;;  %v481_v20 = vmul.f32 %v1159_v17, %v1159_v17  ;;  %v506_v61 = vsub.f32 1.0, %v504_v45 }
 0x433   :  { %v1163_v22 = vpop.eup %1162  ;;  %v531_v24 = vsub.f32 1.0, %v529_v18  ;;  %v456_v26 = vmul.f32 %v1161_v19, %v1161_v19 }
 0x434   :  { %v1165_v30 = vpop.eup %1164  ;;  %v483_v32 = vsub.f32 1.0, %v481_v20  ;;  %v505_v36 = vmul.f32 %v1163_v22, %v1163_v22 }
 0x435   :  { %v1167_v33 = vpop.eup %1166  ;;  %v532_v34 = vpack.c.bf16 %v531_v24, %v530_v23  ;;  %v458_v35 = vsub.f32 1.0, %v456_v26  ;;  %v518_v37 = vmul.f32 %v1165_v30, %v1165_v30 }
 0x436   :  { %v1169_v38 = vpop.eup %1168  ;;  %v484_v39 = vpack.c.bf16 %v483_v32, %v482_v31  ;;  %v519_v40 = vmul.f32 %v1167_v33, %v1167_v33  ;;  %v507_v53 = vsub.f32 1.0, %v505_v36 }
 0x437   :  { %v1171_v43 = vpop.eup %1170  ;;  %534 = vrot.lane.b32.xlu1 %v532_v34, %s1275_s11  ;;  %v470_v46 = vmul.f32 %v1169_v38, %v1169_v38  ;;  %v520_v48 = vsub.f32 1.0, %v518_v37  ;;  %v459_v52 = vpack.c.bf16 %v458_v35, %v457_v44 }
 0x438   :  { %v1173_v47 = vpop.eup %1172  ;;  %486 = vrot.lane.b32.xlu0 %v484_v39, %s1275_s11  ;;  %v521_v49 = vsub.f32 1.0, %v519_v40  ;;  %v471_v50 = vmul.f32 %v1171_v43, %v1171_v43  ;;  %v508_v3 = vpack.c.bf16 %v507_v53, %v506_v61 }
 0x439   :  { %v1175_v51 = vpop.eup %1174  ;;  %v445_v54 = vmul.f32 %v1173_v47, %v1173_v47  ;;  %v472_v57 = vsub.f32 1.0, %v470_v46 }
 0x43a   :  { %v1177_v55 = vpop.eup %1176  ;;  %v522_v56 = vpack.c.bf16 %v521_v49, %v520_v48  ;;  %v473_v58 = vsub.f32 1.0, %v471_v50  ;;  %v446_v59 = vmul.f32 %v1175_v51, %v1175_v51 }
 0x43b   :  { %v1179_v60 = vpop.eup %1178  ;;  %461 = vrot.lane.b32.xlu1 %v459_v52, %s1275_s11  ;;  %v494_v62 = vmul.f32 %v1177_v55, %v1177_v55  ;;  %v447_v0 = vsub.f32 1.0, %v445_v54 }
 0x43c   :  { %523 = vst.msk [vmem:[#allocation2 + $0x18] sm:$0xff] %vm397_vm4, %v522_v56  ;;  %v474_v63 = vpack.c.bf16 %v473_v58, %v472_v57  ;;  %v448_v1 = vsub.f32 1.0, %v446_v59  ;;  %v495_v2 = vmul.f32 %v1179_v60, %v1179_v60 }
 0x43d   :  { %v496_v5 = vsub.f32 1.0, %v494_v62 }
 0x43e   :  { %475 = vst.msk [vmem:[#allocation2 + $0x8] sm:$0xff] %vm397_vm4, %v474_v63  ;;  %v449_v4 = vpack.c.bf16 %v448_v1, %v447_v0  ;;  %v497_v6 = vsub.f32 1.0, %v495_v2 }
 0x43f   :  { %510 = vrot.lane.b32.xlu1 %v508_v3, %s1275_s11  ;;  %s1246_s11 = scalar_lea.vmem %s888_s5, 256 }
 0x440   :  { %450 = vst.msk [vmem:[#allocation2] sm:$0xff] %vm397_vm4, %v449_v4  ;;  %v498_v7 = vpack.c.bf16 %v497_v6, %v496_v5  ;;  %p1247_p10 = scmp.ne.s32.totalorder %s888_s5, %s1246_s11  ;;  %p1252_p12 = scmp.lt.s32.totalorder %s1246_s11, %s1246_s11 }
 0x442   :  { %499 = vst.msk [vmem:[#allocation2 + $0x10] sm:$0xff] %vm397_vm4, %v498_v7  ;;  %p1253_p13 = por %p1252_p12, %p1251_p11 }
 0x444   :  { %p1254_p0 = pnand %p1253_p13, %p1247_p10 }
 0x4a9   :  { %v535_v8 = vpop.permute.xlu1 %534 }
 0x4aa   :  { %537 = vst.msk [vmem:[#allocation2 + $0x18] sm:$0xff] %vm464_vm5, %v535_v8  ;;  %v487_v9 = vpop.permute.xlu0 %486 }
 0x4ab   :  { %489 = vst.msk [vmem:[#allocation2 + $0x8] sm:$0xff] %vm464_vm5, %v487_v9 }
 0x4ad   :  { %v462_v10 = vpop.permute.xlu1 %461 }
 0x4ae   :  { %465 = vst.msk [vmem:[#allocation2] sm:$0xff] %vm464_vm5, %v462_v10 }
 0x4b1   :  { %v511_v11 = vpop.permute.xlu1 %510  ;;  %v541_v12 = vld [vmem:[#allocation2 + $0x18] sm:$0xff] }
 0x4b2   :  { %513 = vst.msk [vmem:[#allocation2 + $0x10] sm:$0xff] %vm464_vm5, %v511_v11  ;;  %v539_v13 = vld [vmem:[#allocation2 + $0x8] sm:$0xff]  ;;  %871 = vmatprep.mubr.bf16.mxu0 %v541_v12 }
 0x4b3   :  { %830 = vmatprep.mubr.bf16.mxu1 %v539_v13 }
 0x4b5   :  { %v538_v14 = vld [vmem:[#allocation2] sm:$0xff] }
 0x4b6   :  { %831 = vmatmul.mubr.bf16.vlgmr.msra.gmra.mrb[0].mxu1 %v538_v14 }
 0x4b9   :  { %v540_v15 = vld [vmem:[#allocation2 + $0x10] sm:$0xff] }
 0x4ba   :  { %872 = vmatmul.mubr.bf16.vlgmr.msra.gmra.mrb[4].mxu0 %v540_v15 }
 0x589   :  { %v1022_v16 = vpop.f32.mrb[0].mxu1 }
 0x58a   :  { %v1023_v17 = vpop.f32.mrb[1].mxu1 }
 0x58b   :  { %v1024_v18 = vadd.f32 %v1023_v17, %v1022_v16  ;;  %v1025_v19 = vpop.f32.mrb[2].mxu1 }
 0x58c   :  { %v1026_v20 = vpop.f32.mrb[3].mxu1 }
 0x58d   :  { %v1027_v21 = vadd.f32 %v1026_v20, %v1025_v19  ;;  %v1044_v22 = vpop.f32.mrb[4].mxu0 }
 0x58e   :  { %v1045_v23 = vpop.f32.mrb[5].mxu0 }
 0x58f   :  { %v1046_v24 = vadd.f32 %v1045_v23, %v1044_v22  ;;  %v1047_v25 = vpop.f32.mrb[6].mxu0 }
 0x590   :  { %v1048_v26 = vpop.f32.mrb[7].mxu0 }
 0x591   :  { %v874_v27 = vadd.f32 %v1046_v24, %v1024_v18  ;;  %v1049_v28 = vadd.f32 %v1048_v26, %v1047_v25 }
 0x593   :  { %880 = vst [vmem:[#allocation9] sm:$0xff] %v874_v27  ;;  %v877_v29 = vadd.f32 %v1049_v28, %v1027_v21 }
 0x595   :  { %881 = vst [vmem:[#allocation9 + $0x8] sm:$0xff] %v877_v29 }
 0x596   :  { %1257 = shalt.err (!%p1254_p0)
}
 0x597   :  { %s1258_s27 = scalar_lea.hbm %s1423_s7, 256 }
 0x598   :  { %p1259_p1 = scmp.ne.s32.totalorder %s1423_s7, %s1258_s27  ;;  %p1262_p2 = scmp.lt.u32.totalorder %s1258_s27, %s1423_s7 }
 0x59a   :  { %p1264_p3 = pnand %p1262_p2, %p1259_p1 }
 0x59c   :  { %1267 = shalt.err (!%p1264_p3)
}
 0x59d   :  { %893 = dma.vmem_to_hbm [thread:$0]  %s888_s5, 256, %s1423_s7, [#allocation5], %s1278_s3, %s1278_s3, %s1279_s25  }
 0x59e   :  { %1272 = dma.done.wait [#allocation5], 256  }
 0x59f   :  { %1273 = vsyncadd [#allocation5], 4294967040 }
 0x5a0   :  { %897 = vsyncpa [#allocation4], 1 }
 0x5a1   :  { %898 = vsyncpa [#allocation7], 1 }
 0x5a2   :  { %899 = vsyncpa [#allocation5], 1 }

</bundles_post_ra>
